<compile_context>
chip_gen: v6e
topology: v6e:2x2x1
jax: 0.10.0
libtpu: 0.0.40
codegen_flags: <defaults>
</compile_context>

<pallas_src>
import functools
import math

import jax
import jax.numpy as jnp
import numpy as np
from jax.experimental import pallas as pl
from jax.experimental.pallas import tpu as pltpu


_SMALL_FASTPATH_ELEMS = 4096


def _octave_loss_kernel(product_ref, target_ref, octaves_ref, out_ref, *,
                        log2_f0, rows, cols, block_rows, block_cols,
                        mask_rows, mask_cols):
    i = pl.program_id(0)          # row-tile axis   ("parallel": megacore-sharded)
    j = pl.program_id(1)          # column-tile axis ("arbitrary" reduction)

    # The (8, block_cols) output block has index_map (i, 0): it stays resident
    # in VMEM across the whole j sweep and doubles as the accumulator.
    @pl.when(j == 0)
    def _init():
        out_ref[...] = jnp.zeros_like(out_ref)

    # Native-dtype loads, upcast on the VPU (no wrapper-side .astype HBM pass).
    p = product_ref[...].astype(jnp.float32)            # (block_rows, block_cols)
    t = target_ref[...].astype(jnp.float32)             # (block_rows, block_cols)
    o = octaves_ref[...].astype(jnp.float32)            # (block_rows|1, block_cols)

    # starg = log2(target / (f0 * 2**octaves)) = log2(target) - octaves - log2(f0)
    # -> one EUP transcendental per element instead of exp2 + divide + log2.
    err = jnp.abs(p - (jnp.log2(t) - o - log2_f0))

    def _accumulate(e):
        # Per-step sublane reduce to one (1, block_cols) row of partial sums;
        # a single masked row load/add/store per 128 lanes per step.
        colsum = jnp.sum(e, axis=0, keepdims=True)
        out_ref[0:1, :] = out_ref[0:1, :] + colsum

    if not (mask_rows or mask_cols):
        _accumulate(err)
    else:
        # Only the edge tiles pay for the masking; interior tiles take the
        # bare accumulate path (flags are trace-time, predicate is runtime).
        conds = []
        if mask_rows:
            conds.append(i == pl.num_programs(0) - 1)
        if mask_cols:
            conds.append(j == pl.num_programs(1) - 1)
        on_edge = functools.reduce(jnp.logical_or, conds)

        @pl.when(on_edge)
        def _edge():
            mask = None
            if mask_rows:
                row_ids = i * block_rows + jax.lax.broadcasted_iota(
                    jnp.int32, (block_rows, block_cols), 0)
                mask = row_ids < rows
            if mask_cols:
                col_ids = j * block_cols + jax.lax.broadcasted_iota(
                    jnp.int32, (block_rows, block_cols), 1)
                ok = col_ids < cols
                mask = ok if mask is None else jnp.logical_and(mask, ok)
            # Select before the reduce so NaN/Inf from log2 of padding garbage
            # never reaches the accumulator.
            _accumulate(jnp.where(mask, err, 0.0))

        @pl.when(jnp.logical_not(on_edge))
        def _interior():
            _accumulate(err)


def octave_regression_loss(product: jax.Array,
                           target: jax.Array,
                           octaves: jax.Array,
                           f0: float) -> jax.Array:
    f0 = float(f0)
    assert f0 > 0.0, "base_freq must be positive"
    assert product.shape == target.shape
    full_shape = np.broadcast_shapes(np.shape(octaves), product.shape)
    assert tuple(full_shape) == tuple(product.shape), "octaves not broadcastable"

    n_elems = int(np.prod(product.shape))
    log2_f0 = math.log2(f0)

    # ---- tiny-input fast path: launch + separate reduce dominate there ------
    if n_elems <= _SMALL_FASTPATH_ELEMS:
        pf = product.astype(jnp.float32)
        tf = target.astype(jnp.float32)
        of = jnp.broadcast_to(octaves, product.shape).astype(jnp.float32)
        return jnp.abs(pf - (jnp.log2(tf) - of - log2_f0)).mean()

    # ---- 2-D lane-dense view -------------------------------------------------
    if product.ndim <= 1:
        rows, cols = 1, n_elems
    else:
        rows = int(np.prod(product.shape[:-1]))
        cols = int(product.shape[-1])

    oct_shape = np.shape(octaves)
    oct_size = int(np.prod(oct_shape)) if len(oct_shape) else 1
    oct_is_full = (oct_size == n_elems)
    oct_is_lane_vec = (not oct_is_full) and (oct_size in (1, cols)) and all(
        int(d) == 1 for d in oct_shape[:-1])

    if not (oct_is_full or oct_is_lane_vec):
        # TODO(synk): arbitrary broadcast layouts (e.g. per-row octaves) fall
        # back to materializing the broadcast; embedding.get_octave_data() is
        # a per-frequency-bin vector in practice, so this path is unexpected.
        octaves = jnp.broadcast_to(octaves, product.shape)
        oct_is_full, oct_is_lane_vec = True, False
        oct_size = n_elems

    # Lane-dense flat reshape when the trailing dim is lane-unfriendly and the
    # reshape is free (no pad copies; only valid when octaves is per-element
    # or a scalar).
    if (oct_is_full or oct_size == 1) and (cols % 128 != 0):
        lane = 0
        for cand in range(1024, 127, -128):
            if n_elems % cand == 0:
                lane = cand
                break
        if lane:
            rows, cols = n_elems // lane, lane

    p2 = product.reshape(rows, cols)
    t2 = target.reshape(rows, cols)
    if oct_is_full:
        o2 = octaves.reshape(rows, cols)
        oct_row_mode = False
    else:
        o2 = jnp.reshape(octaves, (1, -1))
        if oct_size == 1:
            o2 = jnp.broadcast_to(o2, (1, cols))     # tiny (one row), not O(N)
        oct_row_mode = True

    # ---- per-generation tile / VMEM budget -----------------------------------
    try:
        info = pltpu.get_tpu_info()
        vmem_cap = int(getattr(info, "vmem_capacity_bytes", 64 * 1024 * 1024))
    except Exception:  # pragma: no cover - conservative fallback
        vmem_cap = 64 * 1024 * 1024
    # 128 MiB parts (v5e/v6e) -> 96 MiB limit, ~4 MiB tiles;
    # 64 MiB parts (v7x per TC) -> 48 MiB limit, ~3 MiB tiles.
    vmem_limit = max(32 * 1024 * 1024, min(96 * 1024 * 1024, (vmem_cap * 3) // 4))
    tile_budget_bytes = max(1024 * 1024, min(4 * 1024 * 1024, vmem_limit // 16))
    max_block_elems = tile_budget_bytes // 4         # budgeted as f32 elements

    block_cols = cols if cols <= 1024 else 1024
    max_rows = max(8, max_block_elems // block_cols)
    if rows <= max_rows:
        block_rows = rows
    else:
        block_rows = max(8, (max_rows // 32) * 32)

    n_row_tiles = pl.cdiv(rows, block_rows)
    # v7x has 2 TensorCores: keep >= 2 tiles on the "parallel" axis when the
    # problem is big enough to split (harmless extra grid step on 1-TC chips).
    if n_row_tiles < 2 and rows >= 64:
        block_rows = ((pl.cdiv(rows, 2) + 31) // 32) * 32
        n_row_tiles = pl.cdiv(rows, block_rows)
    n_col_tiles = pl.cdiv(cols, block_cols)

    mask_rows = (rows % block_rows) != 0
    mask_cols = (cols % block_cols) != 0

    kernel = functools.partial(
        _octave_loss_kernel,
        log2_f0=log2_f0, rows=rows, cols=cols,
        block_rows=block_rows, block_cols=block_cols,
        mask_rows=mask_rows, mask_cols=mask_cols)

    tile_spec = pl.BlockSpec((block_rows, block_cols), lambda i, j: (i, j))
    if oct_row_mode:
        oct_spec = pl.BlockSpec((1, block_cols), lambda i, j: (0, j))
    else:
        oct_spec = tile_spec

    bytes_in = int(p2.size) * p2.dtype.itemsize \
        + int(t2.size) * t2.dtype.itemsize \
        + int(o2.size) * o2.dtype.itemsize
    bytes_out = int(n_row_tiles) * 8 * block_cols * 4
    cost = pl.CostEstimate(flops=4 * n_elems, transcendentals=n_elems,
                           bytes_accessed=bytes_in + bytes_out)

    partials = pl.pallas_call(
        kernel,
        out_shape=jax.ShapeDtypeStruct((n_row_tiles * 8, block_cols),
                                       jnp.float32),
        grid_spec=pltpu.PrefetchScalarGridSpec(
            num_scalar_prefetch=0,
            grid=(n_row_tiles, n_col_tiles),
            in_specs=[tile_spec, tile_spec, oct_spec],
            out_specs=pl.BlockSpec((8, block_cols), lambda i, j: (i, 0))),
        compiler_params=pltpu.CompilerParams(
            dimension_semantics=("parallel", "arbitrary"),
            vmem_limit_bytes=int(vmem_limit)),
        cost_estimate=cost,
    )(p2, t2, o2)

    # Tiny cross-tile reduction + mean normalization (negligible XLA op).
    return jnp.sum(partials) / jnp.float32(n_elems)


def _reference_loss_np(product, target, octaves, f0):
    """Original PyTorch formula, evaluated in float64 on the host."""
    p = np.asarray(product, dtype=np.float64)
    t = np.asarray(target, dtype=np.float64)
    o = np.broadcast_to(np.asarray(octaves, dtype=np.float64), p.shape)
    base_f = float(f0) * np.exp2(o)
    starg = np.log2(t / base_f)
    return np.abs(p - starg).mean()


if __name__ == "__main__":
    f0 = 0.025   # cfg.base_freq (deterministic, in-script)
    # TODO(synk): embedding.get_octave_data() has no Pallas equivalent; the
    # octave tensor is supplied explicitly as a kernel input.
    keys = jax.random.split(jax.random.PRNGKey(0), 9)

    # Case 1: typical module use -- a batch of spectra with one octave value
    # per frequency bin.  Exercises the Pallas path, the un-broadcast octave
    # stream, column tiling (cols > 1024) and column-edge masking.
    B, F = 64, 1300
    oct1 = jax.random.randint(keys[0], (F,), 0, 8).astype(jnp.float32)
    tgt1 = f0 * jnp.exp2(oct1)[None, :] * jax.random.uniform(
        keys[1], (B, F), minval=0.5, maxval=2.0, dtype=jnp.float32)
    prd1 = jax.random.normal(keys[2], (B, F), dtype=jnp.float32)
    loss1 = octave_regression_loss(prd1, tgt1, oct1, f0)
    jax.block_until_ready(loss1)
    np.testing.assert_allclose(np.asarray(loss1),
                               _reference_loss_np(prd1, tgt1, oct1, f0),
                               rtol=1e-4, atol=1e-6)

    # Case 2: full-shape octaves with a lane-unfriendly trailing dim
    # (exercises the flat lane-dense reshape path).
    shape2 = (48, 96)
    oct2 = jax.random.randint(keys[3], shape2, 0, 8).astype(jnp.float32)
    tgt2 = f0 * jnp.exp2(oct2) * jax.random.uniform(
        keys[4], shape2, minval=0.5, maxval=2.0, dtype=jnp.float32)
    prd2 = jax.random.normal(keys[5], shape2, dtype=jnp.float32)
    loss2 = octave_regression_loss(prd2, tgt2, oct2, f0)
    jax.block_until_ready(loss2)
    np.testing.assert_allclose(np.asarray(loss2),
                               _reference_loss_np(prd2, tgt2, oct2, f0),
                               rtol=1e-4, atol=1e-6)

    # Case 3: tiny input takes the fused-XLA fast path (no Pallas launch).
    shape3 = (4, 128)
    oct3 = jax.random.randint(keys[6], (128,), 0, 8).astype(jnp.float32)
    tgt3 = f0 * jnp.exp2(oct3)[None, :] * jax.random.uniform(
        keys[7], shape3, minval=0.5, maxval=2.0, dtype=jnp.float32)
    prd3 = jax.random.normal(keys[8], shape3, dtype=jnp.float32)
    loss3 = octave_regression_loss(prd3, tgt3, oct3, f0)
    jax.block_until_ready(loss3)
    np.testing.assert_allclose(np.asarray(loss3),
                               _reference_loss_np(prd3, tgt3, oct3, f0),
                               rtol=1e-4, atol=1e-6)

    print("KERNEL_OK")
</pallas_src>

<mosaic_0001>
module attributes {stable_mosaic.version = 11 : i64} {
  func.func @_octave_loss_kernel(%arg0: i32, %arg1: i32, %arg2: memref<32x1024xf32, #tpu.memory_space<vmem>>, %arg3: memref<32x1024xf32, #tpu.memory_space<vmem>>, %arg4: memref<1x1024xf32, #tpu.memory_space<vmem>>, %arg5: memref<8x1024xf32, #tpu.memory_space<vmem>>) attributes {dimension_semantics = [#tpu.dimension_semantics<parallel>, #tpu.dimension_semantics<arbitrary>], iteration_bounds = array<i64: 2, 2>, scalar_prefetch = 0 : i64, scratch_operands = 0 : i64, tpu.core_type = #tpu.core_type<tc>, window_params = [{transform_indices = @transform_0, window_bounds = array<i64: 32, 1024>}, {transform_indices = @transform_1, window_bounds = array<i64: 32, 1024>}, {transform_indices = @transform_2, window_bounds = array<i64: 1, 1024>}, {transform_indices = @transform_3, window_bounds = array<i64: 8, 1024>}]} {
    %c0_i32 = arith.constant 0 : i32
    %0 = arith.cmpi eq, %arg1, %c0_i32 : i32
    %1 = arith.extui %0 : i1 to i32
    %c0_i32_0 = arith.constant 0 : i32
    %2 = arith.cmpi ne, %1, %c0_i32_0 : i32
    scf.if %2 {
      %cst_9 = arith.constant 0.000000e+00 : f32
      %22 = vector.broadcast %cst_9 : f32 to vector<8x1024xf32>
      %c0_10 = arith.constant 0 : index
      %c0_11 = arith.constant 0 : index
      %23 = vector.load %arg5[%c0_10, %c0_11] : memref<8x1024xf32, #tpu.memory_space<vmem>>, vector<8x1024xf32>
      tpu.vector_store %arg5[%c0_10, %c0_11], %22 {strides = array<i32>} : memref<8x1024xf32, #tpu.memory_space<vmem>>, vector<8x1024xf32>,
    } else {
    }
    %c0 = arith.constant 0 : index
    %c0_1 = arith.constant 0 : index
    %3 = vector.load %arg2[%c0, %c0_1] : memref<32x1024xf32, #tpu.memory_space<vmem>>, vector<32x1024xf32>
    %c0_2 = arith.constant 0 : index
    %c0_3 = arith.constant 0 : index
    %4 = vector.load %arg3[%c0_2, %c0_3] : memref<32x1024xf32, #tpu.memory_space<vmem>>, vector<32x1024xf32>
    %c0_4 = arith.constant 0 : index
    %c0_5 = arith.constant 0 : index
    %5 = vector.load %arg4[%c0_4, %c0_5] : memref<1x1024xf32, #tpu.memory_space<vmem>>, vector<1x1024xf32>
    %6 = math.log %4 : vector<32x1024xf32>
    %cst = arith.constant 2.000000e+00 : f32
    %7 = math.log %cst : f32
    %8 = vector.broadcast %7 : f32 to vector<32x1024xf32>
    %9 = arith.divf %6, %8 : vector<32x1024xf32>
    %10 = vector.broadcast %5 : vector<1x1024xf32> to vector<32x1024xf32>
    %11 = arith.subf %9, %10 : vector<32x1024xf32>
    %cst_6 = arith.constant -5.32192802 : f32
    %12 = vector.broadcast %cst_6 : f32 to vector<32x1024xf32>
    %13 = arith.subf %11, %12 : vector<32x1024xf32>
    %14 = arith.subf %3, %13 : vector<32x1024xf32>
    %15 = math.absf %14 : vector<32x1024xf32>
    %c1_i32 = arith.constant 1 : i32
    %16 = arith.cmpi eq, %arg1, %c1_i32 : i32
    %17 = arith.extui %16 : i1 to i32
    %c0_i32_7 = arith.constant 0 : i32
    %18 = arith.cmpi ne, %17, %c0_i32_7 : i32
    scf.if %18 {
      %c1024_i32 = arith.constant 1024 : i32
      %22 = arith.muli %arg1, %c1024_i32 : i32
      %23 = tpu.iota {dimensions = array<i32: 1>} : vector<32x1024xi32>
      %24 = vector.broadcast %22 : i32 to vector<32x1024xi32>
      %25 = arith.addi %24, %23 : vector<32x1024xi32>
      %c1300_i32 = arith.constant 1300 : i32
      %26 = vector.broadcast %c1300_i32 : i32 to vector<32x1024xi32>
      %27 = arith.cmpi slt, %25, %26 : vector<32x1024xi32>
      %cst_9 = arith.constant 0.000000e+00 : f32
      %28 = vector.broadcast %cst_9 : f32 to vector<32x1024xf32>
      %29 = arith.select %27, %15, %28 : vector<32x1024xi1>, vector<32x1024xf32>
      %cst_10 = arith.constant dense<0.000000e+00> : vector<1024xf32>
      %30 = vector.multi_reduction <add>, %29, %cst_10 [0] : vector<32x1024xf32> to vector<1024xf32>
      %31 = vector.shape_cast %30 : vector<1024xf32> to vector<1x1024xf32>
      %c0_11 = arith.constant 0 : index
      %c0_12 = arith.constant 0 : index
      %32 = vector.load %arg5[%c0_11, %c0_12] : memref<8x1024xf32, #tpu.memory_space<vmem>>, vector<1x1024xf32>
      %33 = arith.addf %32, %31 : vector<1x1024xf32>
      %c0_13 = arith.constant 0 : index
      %c0_14 = arith.constant 0 : index
      %34 = vector.load %arg5[%c0_13, %c0_14] : memref<8x1024xf32, #tpu.memory_space<vmem>>, vector<1x1024xf32>
      tpu.vector_store %arg5[%c0_13, %c0_14], %33 {strides = array<i32>} : memref<8x1024xf32, #tpu.memory_space<vmem>>, vector<1x1024xf32>,
    } else {
    }
    %true = arith.constant true
    %19 = arith.xori %16, %true : i1
    %20 = arith.extui %19 : i1 to i32
    %c0_i32_8 = arith.constant 0 : i32
    %21 = arith.cmpi ne, %20, %c0_i32_8 : i32
    scf.if %21 {
      %cst_9 = arith.constant dense<0.000000e+00> : vector<1024xf32>
      %22 = vector.multi_reduction <add>, %15, %cst_9 [0] : vector<32x1024xf32> to vector<1024xf32>
      %23 = vector.shape_cast %22 : vector<1024xf32> to vector<1x1024xf32>
      %c0_10 = arith.constant 0 : index
      %c0_11 = arith.constant 0 : index
      %24 = vector.load %arg5[%c0_10, %c0_11] : memref<8x1024xf32, #tpu.memory_space<vmem>>, vector<1x1024xf32>
      %25 = arith.addf %24, %23 : vector<1x1024xf32>
      %c0_12 = arith.constant 0 : index
      %c0_13 = arith.constant 0 : index
      %26 = vector.load %arg5[%c0_12, %c0_13] : memref<8x1024xf32, #tpu.memory_space<vmem>>, vector<1x1024xf32>
      tpu.vector_store %arg5[%c0_12, %c0_13], %25 {strides = array<i32>} : memref<8x1024xf32, #tpu.memory_space<vmem>>, vector<1x1024xf32>,
    } else {
    }
    return
  }
  func.func @transform_0(%arg0: i32, %arg1: i32) -> (i32, i32) {
    %c0_i32 = arith.constant 0 : i32
    return %arg0, %arg1 : i32, i32
  }
  func.func @transform_1(%arg0: i32, %arg1: i32) -> (i32, i32) {
    %c0_i32 = arith.constant 0 : i32
    return %arg0, %arg1 : i32, i32
  }
  func.func @transform_2(%arg0: i32, %arg1: i32) -> (i32, i32) {
    %c0_i32 = arith.constant 0 : i32
    %c0_i32_0 = arith.constant 0 : i32
    return %c0_i32, %arg1 : i32, i32
  }
  func.func @transform_3(%arg0: i32, %arg1: i32) -> (i32, i32) {
    %c0_i32 = arith.constant 0 : i32
    %c0_i32_0 = arith.constant 0 : i32
    return %arg0, %c0_i32 : i32, i32
  }
}

</mosaic_0001>

<bundles_post_ra>
// kernel: tpu_custom_call.1
= control target key start
LH: loop header
LB: loop body
LE: loop exit
PB: predicated region body
PF: predicated region fallthrough
CT: control target
= control target key end

     0   :  { %s2571_s0 = inlined_call_operand.hbm [shape: f32[64,1300], index: 0, kind: input, shape index: {}]   ;;  %s2572_s1 = inlined_call_operand.hbm [shape: f32[64,1300], index: 1, kind: input, shape index: {}]   ;;  %s2573_s2 = inlined_call_operand.hbm [shape: f32[1,1300], index: 2, kind: input, shape index: {}]   ;;  %s2574_s3 = inlined_call_operand.hbm [shape: f32[16,1024], index: 3, kind: output, shape index: {}]  }
   0x1   :  { %2608 = sst [smem:[#allocation47_spill]] %s2574_s3 }
   0x2   :  { %8 = vsyncpa [#allocation3], 0 }
   0x3   :  { %10 = vsyncpa [#allocation3 + $0x1], 0 }
   0x4   :  { %11 = vsyncpa [#allocation6], 0 }
   0x5   :  { %13 = vsyncpa [#allocation6 + $0x1], 0 }
   0x6   :  { %14 = vsyncpa [#allocation4], 0 }
   0x7   :  { %16 = vsyncpa [#allocation4 + $0x1], 0  ;;  %s1688_s12 = smov 0   ;;  %s1690_s13 = smov 0  }
   0x8   :  { %s1692_s14 = smov 0   ;;  %s1694_s15 = smov 0  }
   0x9   :  { %s1696_s16 = smov 0   ;;  %s1698_s17 = smov 0  }
   0xa   :  { %s1700_s18 = smov 0   ;;  %s1702_s19 = smov 0  }
   0xb   :  { %s1704_s20 = smov 0   ;;  %s1706_s21 = smov 0  }
   0xc   :  { %s1708_s22 = smov 0   ;;  %s1710_s23 = smov 0  }
   0xd   :  { %s1712_s24 = smov 0   ;;  %s1714_s25 = smov 0  }
   0xe LB: > { %2609 = sst [smem:[#allocation13_spill]] %s1603_s12  ;;  %s1757_s26 = sadd.s32 4294967295, %s1655_s25   ;;  %s1655_s25 = sphi %s1714_s25, %s22_s25   ;;  %s1651_s24 = sphi %s1712_s24, %s2701_s24   ;;  %s1647_s23 = sphi %s1710_s23, %s2700_s23   ;;  %s1643_s22 = sphi %s1708_s22, %s2699_s22   ;;  %s1639_s21 = sphi %s1706_s21, %s2698_s21   ;;  %s1635_s20 = sphi %s1704_s20, %s2697_s20   ;;  %s1631_s19 = sphi %s1702_s19, %s2696_s19   ;;  %s1627_s18 = sphi %s1700_s18, %s2695_s18   ;;  %s1623_s17 = sphi %s1698_s17, %s2694_s17   ;;  %s1619_s16 = sphi %s1696_s16, %s2693_s16   ;;  %s1615_s15 = sphi %s1694_s15, %s2692_s15   ;;  %s1611_s14 = sphi %s1692_s14, %s2687_s14   ;;  %s1607_s13 = sphi %s1690_s13, %s2686_s13   ;;  %s1603_s12 = sphi %s1688_s12, %s2685_s12  }
   0xf   : > { %2610 = sst [smem:[#allocation14_spill]] %s1607_s13  ;;  %s31_s28 = sadd.s32 1, %s1647_s23 }
  0x10   : > { %2611 = sst [smem:[#allocation15_spill]] %s1611_s14  ;;  %s34_s29 = sadd.s32 1, %s1651_s24 }
  0x11   : > { %2612 = sst [smem:[#allocation16_spill]] %s1639_s21  ;;  %p32_p0 = scmp.ge.s32.totalorder %s31_s28, 2 }
  0x12   : > { %2613 = sst [smem:[#allocation17_spill]] %s1643_s22  ;;  %s43_s30 = sadd.s32 1, %s1635_s20 }
  0x13   : > { %p50_p1 = scmp.ne.s32.totalorder %s1635_s20, %s1631_s19  ;;  %p51_p2 = scmp.eq.s32.totalorder %s1655_s25, 0 }
  0x14   : > { %s2703_s28 = smov (%p32_p0, %s31_s28), 0  ;;  %s2705_s29 = smov (!%p32_p0, %s34_s29), %s1651_s24 }
  0x15   : > { %2614 = sst [smem:[#allocation18_spill]] %s2703_s28  ;;  %s39_s4 = ssub.s32 %s1647_s23, %s2703_s28 }
  0x16   : > { %p1773_p3 = por %p51_p2, %p50_p1  ;;  %p36_p4 = scmp.ge.s32.totalorder %s2705_s29, 2 }
  0x17   : > { %p56_p5 = scmp.ne.s32.totalorder %s1631_s19, %s1627_s18  ;;  %p57_p6 = scmp.eq.s32.totalorder %s1757_s26, 0 }
  0x18   : > { %p95_p7 = scmp.eq.s32.totalorder %s39_s4, 0  ;;  %s2707_s29 = smov (%p36_p4, %s2705_s29), 0 }
  0x19   : > { %2616 = sst [smem:[#allocation19_spill]] %s2707_s29  ;;  %p1783_p8 = por %p57_p6, %p56_p5 }
  0x1a   : > { %s97_s7 = sadd.s32 1, %s1623_s17  ;;  %s38_s8 = ssub.s32 %s1651_s24, %s2707_s29 }
  0x1b   : > { %p104_p9 = scmp.ne.s32.totalorder %s1623_s17, %s1619_s16  ;;  %s40_s9 = sor.u32 %s39_s4, %s38_s8 }
  0x1c   : > { %p110_p10 = scmp.ne.s32.totalorder %s1619_s16, %s1615_s15  ;;  %p41_p11 = scmp.eq.s32.totalorder %s40_s9, 0 }
  0x1d   : > { %p1796_p12 = por %p104_p9, %p51_p2  ;;  %p121_p0 = scmp.eq.s32.totalorder %s38_s8, 0 }
  0x1e   : > { %s1801_s11 = scalar_select %p95_p7, %s1623_s17, %s97_s7  }
  0x1f   : > { %s1804_s18 = scalar_select %p41_p11, %s1635_s20, %s43_s30  }
  0x20   : > { %2619 = sst [smem:[#allocation20_spill]] %s1801_s11  ;;  %p1808_p13 = por %p110_p10, %p57_p6 }
  0x21   : > { %2620 = sst [smem:[#allocation21_spill]] %s1804_s18  ;;  %s123_s29 = sadd.s32 1, %s1611_s14 }
  0x22   : > { %s2621_s27 = scalar_select %p1808_p13, 1, 0 }
  0x23   : > { %p133_p1 = scmp.ne.s32.totalorder %s1611_s14, %s1607_s13  ;;  %p134_p4 = scmp.eq.s32.totalorder %s1757_s26, 3 }
  0x24   : > { %2622 = sst [smem:[#allocation22_spill]] %s2621_s27  ;;  %p139_p5 = scmp.ne.s32.totalorder %s1607_s13, %s1603_s12 }
  0x25   : > { %s1816_s4 = scalar_select %p121_p0, %s1611_s14, %s123_s29  }
  0x26   : > { %s2624_s15 = sadd.s32 4294967294, %s1655_s25   ;;  %p1823_p9 = por %p134_p4, %p133_p1 }
  0x27   : > { %2623 = sst [smem:[#allocation23_spill]] %s1816_s4  ;;  %p140_p2 = scmp.eq.s32.totalorder %s2624_s15, 3 }
  0x28   : > { %s2625_s9 = scalar_select %p1823_p9, 1, 0 }
  0x29   : > { %p1827_p7 = por %p140_p2, %p139_p5  ;;  %p1152_p6 = scmp.ge.s32.totalorder %s1655_s25, 4 }
  0x2a   : > { %2626 = sst [smem:[#allocation24_spill]] %s2625_s9 }
  0x2b   : > { %s2627_s30 = scalar_select %p1827_p7, 1, 0 }
  0x2c   : > { %156 = sbr.rel (%p1152_p6) target bundleno = 128 (0x80), region = 16 }
  0x2d   : > { %2628 = sst [smem:[#allocation25_spill]] %s2627_s30 }
  0x31   : > { %159 = sbr.rel (!%p1773_p3) target bundleno = 73 (0x49), region = 20  ;;  %s160_s29 = sand.u32 (%p1773_p3), 1, %s1635_s20  }
  0x32   : > { %s1155_s7 = sshll.u32 (%p1773_p3), %s1647_s23, 3  ;;  %s1153_s8 = sshll.u32 (%p1773_p3), %s160_s29, 8 }
  0x33   : > { %s167_s15 = ssub.s32 (%p1773_p3), 11, %s1155_s7  ;;  %s1842_s11 = scalar_lea.sflag (%p1773_p3), [#allocation3], %s160_s29 }
  0x34   : > { %p168_p10 = scmp.lt.s32.totalorder (%p1773_p3), %s167_s15, 8  ;;  %s164_s4 = scalar_lea.vmem (%p1773_p3), [#allocation2], %s1153_s8 }
  0x36   : > { %s2709_s15 = smov (!%p168_p10, %s167_s15), 8 }
  0x37   : > { %s1839_s28 = sshll.u32 %s2709_s15, 9 }
  0x38   : > { %s172_s18 = ssub.s32 4096, %s1839_s28 }
  0x39   : > { %173 = vsyncadd %s1842_s11, %s172_s18  ;;  %p1157_p11 = scmp.ne.s32.totalorder %s1839_s28, 0  ;;  %s1230_s14 = smul.u32 44, %s1651_s24 }
  0x3a   : > { %s1160_s30 = sshll.u32 %s2709_s15, 3  ;;  %s181_s12 = sshll.u32 %s164_s4, 4  ;;  %s182_s12 = int_to_ptr.vmem [resolvable:$true] %s181_s12 }
  0x3b   : > { %s176_s3 = sadd.s32 %s1230_s14, %s1155_s7  ;;  %s1437_s13 = scalar_lea.vmem %s182_s12, %s1839_s28 }
  0x3c   : > { %s1159_s9 = sshll.u32 %s176_s3, 7  ;;  %p1438_p0 = scmp.ne.s32.totalorder %s182_s12, %s1437_s13 }
  0x3d   : > { %s178_s29 = scalar_lea.hbm %s2571_s0, %s1159_s9  ;;  %s1657_s18 = smov [#allocation2]  }
  0x3e   : > { %p1439_p1 = pnand %p1438_p0, %p1157_p11  ;;  %s1441_s8 = sshll.u32 %s1657_s18, 4  ;;  %s1442_s8 = int_to_ptr.vmem [resolvable:$false] %s1441_s8 }
  0x3f   : > { %s1443_s27 = scalar_lea.vmem %s1442_s8, 8192  ;;  %p1444_p5 = scmp.lt.s32.totalorder %s182_s12, %s1442_s8 }
  0x40   : > { %p1440_p4 = pneg %p1439_p1  ;;  %p1445_p2 = scmp.lt.s32.totalorder %s1443_s27, %s1437_s13 }
  0x42   : > { %p1446_p6 = por %p1445_p2, %p1444_p5 }
  0x44   : > { %p1447_p10 = pnand %p1446_p6, %p1440_p4 }
  0x46   : > { %1450 = shalt.err (!%p1447_p10)
}
  0x47   : > { %s1658_s14 = smov 1408   ;;  %s1659_s3 = smov 1024  }
  0x48   : > { %187 = dma.hbm_to_vmem [thread:$0]  (%p1157_p11), %s178_s29, %s1839_s28, %s182_s12, %s1842_s11, %s1658_s14, %s1659_s3, %s1160_s30  }
  0x49 PF: > { %190 = sbr.rel (!%p1773_p3) target bundleno = 97 (0x61), region = 24  ;;  %s191_s21 = sand.u32 (%p1773_p3), 1, %s1655_s25  }
  0x4a   : > { %s193_s22 = sand.u32 (%p1773_p3), 1, %s1635_s20   ;;  %s1165_s27 = sshll.u32 (%p1773_p3), %s1647_s23, 3 }
  0x4b   : > { %s1163_s13 = sshll.u32 (%p1773_p3), %s193_s22, 8  ;;  %s198_s4 = ssub.s32 (%p1773_p3), 11, %s1165_s27 }
  0x4c   : > { %p199_p0 = scmp.lt.s32.totalorder (%p1773_p3), %s198_s4, 8  ;;  %s1869_s28 = scalar_lea.sflag (%p1773_p3), [#allocation6], %s191_s21 }
  0x4d   : > { %s195_s5 = scalar_lea.vmem (%p1773_p3), [#allocation5], %s1163_s13 }
  0x4e   : > { %s2711_s4 = smov (!%p199_p0, %s198_s4), 8 }
  0x4f   : > { %s1866_s9 = sshll.u32 %s2711_s4, 9 }
  0x50   : > { %s203_s12 = ssub.s32 4096, %s1866_s9 }
  0x51   : > { %204 = vsyncadd %s1869_s28, %s203_s12  ;;  %p1167_p3 = scmp.ne.s32.totalorder %s1866_s9, 0  ;;  %s1231_s11 = smul.u32 44, %s1651_s24 }
  0x52   : > { %s1170_s30 = sshll.u32 %s2711_s4, 3  ;;  %s212_s7 = sshll.u32 %s195_s5, 4  ;;  %s213_s7 = int_to_ptr.vmem [resolvable:$true] %s212_s7 }
  0x53   : > { %s207_s15 = sadd.s32 %s1231_s11, %s1165_s27  ;;  %s1463_s3 = scalar_lea.vmem %s213_s7, %s1866_s9 }
  0x54   : > { %s1169_s29 = sshll.u32 %s207_s15, 7  ;;  %p1464_p11 = scmp.ne.s32.totalorder %s213_s7, %s1463_s3 }
  0x55   : > { %s209_s14 = scalar_lea.hbm %s2572_s1, %s1169_s29  ;;  %s1660_s21 = smov [#allocation5]  }
  0x56   : > { %p1465_p1 = pnand %p1464_p11, %p1167_p3  ;;  %s1467_s22 = sshll.u32 %s1660_s21, 4  ;;  %s1468_s22 = int_to_ptr.vmem [resolvable:$false] %s1467_s22 }
  0x57   : > { %s1469_s13 = scalar_lea.vmem %s1468_s22, 8192  ;;  %p1470_p5 = scmp.lt.s32.totalorder %s213_s7, %s1468_s22 }
  0x58   : > { %p1466_p4 = pneg %p1465_p1  ;;  %p1471_p2 = scmp.lt.s32.totalorder %s1469_s13, %s1463_s3 }
  0x5a   : > { %p1472_p6 = por %p1471_p2, %p1470_p5 }
  0x5c   : > { %p1473_p10 = pnand %p1472_p6, %p1466_p4 }
  0x5e   : > { %1476 = shalt.err (!%p1473_p10)
}
  0x5f   : > { %s1661_s27 = smov 1408   ;;  %s1662_s4 = smov 1024  }
  0x60   : > { %218 = dma.hbm_to_vmem [thread:$0]  (%p1167_p3), %s209_s14, %s1866_s9, %s213_s7, %s1869_s28, %s1661_s27, %s1662_s4, %s1170_s30  }
  0x61 PF: > { %221 = sbr.rel (!%p1796_p12) target bundleno = 128 (0x80), region = 28  ;;  %s222_s12 = sand.u32 (%p1796_p12), 1, %s1655_s25  }
  0x62   : > { %s224_s5 = sand.u32 (%p1796_p12), 1, %s1623_s17   ;;  %s1174_s15 = sshll.u32 (%p1796_p12), %s1647_s23, 3 }
  0x63   : > { %s1173_s11 = sshll.u32 (%p1796_p12), %s224_s5, 3  ;;  %s228_s29 = ssub.s32 (%p1796_p12), 11, %s1174_s15 }
  0x64   : > { %p229_p0 = scmp.lt.s32.totalorder (%p1796_p12), %s228_s29, 8  ;;  %s1893_s3 = scalar_lea.sflag (%p1796_p12), [#allocation6], %s222_s12 }
  0x65   : > { %s226_s9 = scalar_lea.vmem (%p1796_p12), [#allocation7], %s1173_s11 }
  0x66   : > { %s2713_s29 = smov (!%p229_p0, %s228_s29), 8 }
  0x67   : > { %s1890_s18 = sshll.u32 %s2713_s29, 4 }
  0x68   : > { %s233_s8 = ssub.s32 128, %s1890_s18 }
  0x69   : > { %234 = vsyncadd %s1893_s3, %s233_s8  ;;  %p1176_p12 = scmp.ne.s32.totalorder %s1890_s18, 0  ;;  %s1228_s10 = sshll.u32 %s1647_s23, 7 }
  0x6a   : > { %s237_s7 = scalar_lea.hbm %s2573_s2, %s1228_s10  ;;  %s239_s14 = sshll.u32 %s226_s9, 4  ;;  %s240_s14 = int_to_ptr.vmem [resolvable:$true] %s239_s14 }
  0x6b   : > { %s1477_s21 = scalar_lea.hbm %s237_s7, %s1890_s18  ;;  %s1481_s27 = scalar_lea.hbm %s2573_s2, 176 }
  0x6c   : > { %p1478_p3 = scmp.ne.s32.totalorder %s237_s7, %s1477_s21  ;;  %p1483_p4 = scmp.lt.s32.totalorder %s1481_s27, %s1477_s21 }
  0x6e   : > { %p1479_p11 = pnand %p1478_p3, %p1176_p12 }
  0x70   : > { %p1480_p1 = pneg %p1479_p11 }
  0x72   : > { %p1485_p5 = pnand %p1483_p4, %p1480_p1 }
  0x74   : > { %1488 = shalt.err (!%p1485_p5)
}
  0x75   : > { %s1489_s4 = scalar_lea.vmem %s240_s14, %s1890_s18  ;;  %s1663_s12 = smov [#allocation7]  }
  0x76   : > { %p1490_p2 = scmp.ne.s32.totalorder %s240_s14, %s1489_s4  ;;  %s1493_s5 = sshll.u32 %s1663_s12, 4  ;;  %s1494_s5 = int_to_ptr.vmem [resolvable:$false] %s1493_s5 }
  0x77   : > { %s1495_s11 = scalar_lea.vmem %s1494_s5, 256  ;;  %p1496_p0 = scmp.lt.s32.totalorder %s240_s14, %s1494_s5 }
  0x78   : > { %p1491_p6 = pnand %p1490_p2, %p1176_p12  ;;  %p1497_p3 = scmp.lt.s32.totalorder %s1495_s11, %s1489_s4 }
  0x7a   : > { %p1492_p10 = pneg %p1491_p6  ;;  %p1498_p11 = por %p1497_p3, %p1496_p0 }
  0x7c   : > { %p1499_p7 = pnand %p1498_p11, %p1492_p10 }
  0x7e   : > { %1502 = shalt.err (!%p1499_p7)
}
  0x7f   : > { %242 = dma.hbm_to_vmem [thread:$0]  (%p1176_p12), %s237_s7, %s1890_s18, %s240_s14, %s1893_s3  }
  0x80 PF: > { %p1178_p1 = scmp.ge.s32.totalorder %s1655_s25, 1  ;;  %p244_p4 = scmp.lt.s32.totalorder %s1655_s25, 5 }
  0x82   : > { %p245_p5 = pnand %p1178_p1, %p244_p4 }
  0x84   : > { %248 = sbr.rel (%p245_p5) target bundleno = 371 (0x173), region = 32 }
  0x89   : > { %s250_s15 = sand.u32 1, %s1631_s19  }
  0x8a   : > { %s1179_s29 = sshll.u32 %s250_s15, 8  ;;  %s251_s8 = scalar_lea.sflag [#allocation3], %s250_s15 }
  0x8b   : > { %s1917_s9 = scalar_lea.vmem [#allocation2], %s1179_s29 }
  0x8c   : > { %1586 = dma.done.wait (%p1783_p8), %s251_s8, 4096  }
  0x8d   : > { %1588 = vsyncadd (%p1783_p8), %s251_s8, 4294963200  ;;  %s259_s18 = sand.u32 1, %s1757_s26   ;;  %s1924_s10 = scalar_lea.vmem [#allocation5], %s1179_s29 }
  0x8e   : > { %s260_s3 = scalar_lea.sflag [#allocation6], %s259_s18 }
  0x8f   : > { %1590 = dma.done.wait (%p1783_p8), %s260_s3, 4096  }
  0x90   : > { %1592 = vsyncadd (%p1783_p8), %s260_s3, 4294963200  ;;  %s270_s30 = sand.u32 1, %s1619_s16  }
  0x91   : > { %s1931_s7 = sshll.u32 %s270_s30, 3 }
  0x92   : > { %s272_s14 = scalar_lea.vmem [#allocation7], %s1931_s7 }
  0x93   : > { %1594 = dma.done.wait (%p1808_p13), %s260_s3, 128  }
  0x94   : > { %1596 = vsyncadd (%p1808_p13), %s260_s3, 4294967168  ;;  %s2630_s26 = sld [smem:[#allocation14_spill]] }
  0x95   : > { %s2631_s6 = sld [smem:[#allocation16_spill]] }
  0x9a   : > { %s302_s21 = sand.u32 1, %s2630_s26  }
  0x9b   : > { %s1182_s22 = sshll.u32 %s302_s21, 6  ;;  %p1183_p8 = scmp.ne.s32.totalorder %s2631_s6, 0 }
  0x9c   : > { %s1941_s13 = scalar_lea.vmem [#allocation8], %s1182_s22 }
  0x9d   : > { %325 = sbr.rel (%p1183_p8) target bundleno = 167 (0xa7), region = 48 }
  0xa2   : > { %v1664_v0 = vmov 0.0  }
  0xa3   : > { %326 = vst [vmem:[%s1941_s13] sm:$0xff] %v1664_v0  ;;  %327 = vst [vmem:[%s1941_s13 + $0x8] sm:$0xff] %v1664_v0 }
  0xa4   : > { %328 = vst [vmem:[%s1941_s13 + $0x10] sm:$0xff] %v1664_v0  ;;  %329 = vst [vmem:[%s1941_s13 + $0x18] sm:$0xff] %v1664_v0 }
  0xa5   : > { %330 = vst [vmem:[%s1941_s13 + $0x20] sm:$0xff] %v1664_v0  ;;  %331 = vst [vmem:[%s1941_s13 + $0x28] sm:$0xff] %v1664_v0 }
  0xa6   : > { %332 = vst [vmem:[%s1941_s13 + $0x30] sm:$0xff] %v1664_v0  ;;  %333 = vst [vmem:[%s1941_s13 + $0x38] sm:$0xff] %v1664_v0 }
  0xa7 PF: > { %v366_v1 = vld [vmem:[%s1924_s10] sm:$0xff]  ;;  %v367_v2 = vld [vmem:[%s1924_s10 + $0x8] sm:$0xff]  ;;  %v368_v3 = vld [vmem:[%s1924_s10 + $0x10] sm:$0xff]  ;;  %v497_v9 = vlaneseq  ;;  %s2653_s27 = sld [smem:[#allocation16_spill]] }
  0xa8   : > { %v369_v4 = vld [vmem:[%s1924_s10 + $0x18] sm:$0xff]  ;;  %1361 = vlog2.f32 %v366_v1  ;;  %v370_v5 = vld [vmem:[%s1924_s10 + $0x20] sm:$0xff]  ;;  %v371_v6 = vld [vmem:[%s1924_s10 + $0x28] sm:$0xff] }
  0xa9   : > { %1363 = vlog2.f32 %v367_v2  ;;  %v372_v7 = vld [vmem:[%s1924_s10 + $0x30] sm:$0xff]  ;;  %v373_v8 = vld [vmem:[%s1924_s10 + $0x38] sm:$0xff]  ;;  %v374_v10 = vld [vmem:[%s1924_s10 + $0x40] sm:$0xff]  ;;  %v1965_v14 = vshrl.u32 %v497_v9, 7 }
  0xaa   : > { %1365 = vlog2.f32 %v368_v3  ;;  %v375_v11 = vld [vmem:[%s1924_s10 + $0x48] sm:$0xff]  ;;  %v376_v12 = vld [vmem:[%s1924_s10 + $0x50] sm:$0xff]  ;;  %v377_v13 = vld [vmem:[%s1924_s10 + $0x58] sm:$0xff] }
  0xab   : > { %1367 = vlog2.f32 %v369_v4  ;;  %v378_v15 = vld [vmem:[%s1924_s10 + $0x60] sm:$0xff]  ;;  %v379_v16 = vld [vmem:[%s1924_s10 + $0x68] sm:$0xff]  ;;  %v380_v17 = vld [vmem:[%s1924_s10 + $0x70] sm:$0xff]  ;;  %v499_v19 = vsub.s32 0, %v1965_v14  ;;  %v503_v20 = vsub.s32 1, %v1965_v14  ;;  %v507_v24 = vsub.s32 2, %v1965_v14 }
  0xac   : > { %1369 = vlog2.f32 %v370_v5  ;;  %v381_v18 = vld [vmem:[%s1924_s10 + $0x78] sm:$0xff]  ;;  %v382_v22 = vld [vmem:[%s1924_s10 + $0x80] sm:$0xff]  ;;  %v511_v25 = vsub.s32 3, %v1965_v14  ;;  %v383_v27 = vld [vmem:[%s1924_s10 + $0x88] sm:$0xff]  ;;  %v515_v29 = vsub.s32 4, %v1965_v14  ;;  %v519_v30 = vsub.s32 5, %v1965_v14 }
  0xad   : > { %1371 = vlog2.f32 %v371_v6  ;;  %v398_v23 = vld [vmem:[%s272_s14] sm:$0xff]  ;;  %v384_v32 = vld [vmem:[%s1924_s10 + $0x90] sm:$0xff]  ;;  %v523_v34 = vsub.s32 6, %v1965_v14  ;;  %v527_v35 = vsub.s32 7, %v1965_v14  ;;  %v385_v37 = vld [vmem:[%s1924_s10 + $0x98] sm:$0xff]  ;;  %p1216_p13 = scmp.ne.s32.totalorder %s2653_s27, 1 }
  0xae   : > { %1373 = vlog2.f32 %v372_v7  ;;  %v1985_v39 = vrot.slane %v398_v23, %v499_v19  ;;  %v1987_v40 = vrot.slane %v398_v23, %v503_v20  ;;  %v386_v42 = vld [vmem:[%s1924_s10 + $0xa0] sm:$0xff]  ;;  %v1990_v44 = vrot.slane %v398_v23, %v507_v24  ;;  %v387_v47 = vld [vmem:[%s1924_s10 + $0xa8] sm:$0xff]  ;;  %v388_v52 = vld [vmem:[%s1924_s10 + $0xb0] sm:$0xff]  ;;  %s2654_s4 = sld [smem:[#allocation16_spill]] (!%p1216_p13) }
  0xaf   : > { %1375 = vlog2.f32 %v373_v8  ;;  %v1992_v45 = vrot.slane %v398_v23, %v511_v25  ;;  %v1997_v50 = vrot.slane %v398_v23, %v515_v29  ;;  %v2002_v55 = vrot.slane %v398_v23, %v519_v30  ;;  %v389_v57 = vld [vmem:[%s1924_s10 + $0xb8] sm:$0xff]  ;;  %v390_v62 = vld [vmem:[%s1924_s10 + $0xc0] sm:$0xff]  ;;  %v391_v3 = vld [vmem:[%s1924_s10 + $0xc8] sm:$0xff] }
  0xb0   : > { %1377 = vlog2.f32 %v374_v10  ;;  %v2007_v60 = vrot.slane %v398_v23, %v523_v34  ;;  %v2014_v1 = vrot.slane %v398_v23, %v527_v35  ;;  %v392_v8 = vld [vmem:[%s1924_s10 + $0xd0] sm:$0xff]  ;;  %v394_v20 = vld [vmem:[%s1924_s10 + $0xe0] sm:$0xff]  ;;  %v395_v25 = vld [vmem:[%s1924_s10 + $0xe8] sm:$0xff] }
  0xb1   : > { %1379 = vlog2.f32 %v375_v11  ;;  %v396_v30 = vld [vmem:[%s1924_s10 + $0xf0] sm:$0xff] }
  0xb2   : > { %1381 = vlog2.f32 %v376_v12 }
  0xb3   : > { %1383 = vlog2.f32 %v377_v13 }
  0xb4   : > { %1385 = vlog2.f32 %v378_v15  ;;  %v393_v15 = vld [vmem:[%s1924_s10 + $0xd8] sm:$0xff]  ;;  %s1217_s12 = sshll.u32 (!%p1216_p13), %s2654_s4, 10 }
  0xb5   : > { %v1362_v21 = vpop.eup %1361  ;;  %1387 = vlog2.f32 %v379_v16 }
  0xb6   : > { %v1364_v26 = vpop.eup %1363  ;;  %v400_v28 = vmul.f32 0.6931472, %v1362_v21  ;;  %1389 = vlog2.f32 %v380_v17 }
  0xb7   : > { %v1366_v31 = vpop.eup %1365  ;;  %v402_v33 = vmul.f32 0.6931472, %v1364_v26  ;;  %1391 = vlog2.f32 %v381_v18 }
  0xb8   : > { %v1368_v36 = vpop.eup %1367  ;;  %v404_v38 = vmul.f32 0.6931472, %v1366_v31  ;;  %1393 = vlog2.f32 %v382_v22  ;;  %v1995_v49 = vmul.f32 1.442695, %v400_v28  ;;  %v397_v31 = vld [vmem:[%s1924_s10 + $0xf8] sm:$0xff] }
  0xb9   : > { %v1370_v41 = vpop.eup %1369  ;;  %v406_v43 = vmul.f32 0.6931472, %v1368_v36  ;;  %1395 = vlog2.f32 %v383_v27  ;;  %v2000_v54 = vmul.f32 1.442695, %v402_v33 }
  0xba   : > { %v1372_v46 = vpop.eup %1371  ;;  %v408_v48 = vmul.f32 0.6931472, %v1370_v41  ;;  %1397 = vlog2.f32 %v384_v32  ;;  %v2005_v59 = vmul.f32 1.442695, %v404_v38  ;;  %v537_v6 = vsub.f32 %v1995_v49, %v1985_v39 }
  0xbb   : > { %v1374_v51 = vpop.eup %1373  ;;  %v410_v53 = vmul.f32 0.6931472, %v1372_v46  ;;  %1399 = vlog2.f32 %v385_v37  ;;  %v2010_v63 = vmul.f32 1.442695, %v406_v43  ;;  %v538_v12 = vsub.f32 %v2000_v54, %v1987_v40 }
  0xbc   : > { %v1376_v56 = vpop.eup %1375  ;;  %v412_v58 = vmul.f32 0.6931472, %v1374_v51  ;;  %1401 = vlog2.f32 %v386_v42  ;;  %v2012_v0 = vmul.f32 1.442695, %v408_v48  ;;  %v539_v18 = vsub.f32 %v2005_v59, %v1990_v44 }
  0xbd   : > { %v1378_v61 = vpop.eup %1377  ;;  %1403 = vlog2.f32 %v387_v47  ;;  %v414_v4 = vmul.f32 0.6931472, %v1376_v56  ;;  %v2017_v5 = vmul.f32 1.442695, %v410_v53  ;;  %v540_v22 = vsub.f32 %v2010_v63, %v1992_v45 }
  0xbe   : > { %v1380_v2 = vpop.eup %1379  ;;  %1405 = vlog2.f32 %v388_v52  ;;  %v416_v10 = vmul.f32 0.6931472, %v1378_v61  ;;  %v2022_v11 = vmul.f32 1.442695, %v412_v58  ;;  %v541_v23 = vsub.f32 %v2012_v0, %v1997_v50 }
  0xbf   : > { %v1382_v7 = vpop.eup %1381  ;;  %1407 = vlog2.f32 %v389_v57  ;;  %v418_v16 = vmul.f32 0.6931472, %v1380_v2  ;;  %v2035_v27 = vmul.f32 1.442695, %v414_v4  ;;  %v542_v28 = vsub.f32 %v2017_v5, %v2002_v55 }
  0xc0   : > { %v1384_v13 = vpop.eup %1383  ;;  %v420_v17 = vmul.f32 0.6931472, %v1382_v7  ;;  %1409 = vlog2.f32 %v390_v62  ;;  %v2041_v33 = vmul.f32 1.442695, %v416_v10  ;;  %v543_v34 = vsub.f32 %v2022_v11, %v2007_v60 }
  0xc1   : > { %v1386_v19 = vpop.eup %1385  ;;  %v422_v21 = vmul.f32 0.6931472, %v1384_v13  ;;  %1411 = vlog2.f32 %v391_v3  ;;  %v2045_v37 = vmul.f32 1.442695, %v418_v16  ;;  %v544_v52 = vsub.f32 %v2035_v27, %v2014_v1 }
  0xc2   : > { %v1388_v24 = vpop.eup %1387  ;;  %v424_v26 = vmul.f32 0.6931472, %v1386_v19  ;;  %1413 = vlog2.f32 %v392_v8  ;;  %v2047_v38 = vmul.f32 1.442695, %v420_v17  ;;  %v545_v58 = vsub.f32 %v2041_v33, %v1985_v39 }
  0xc3   : > { %v1390_v29 = vpop.eup %1389  ;;  %v426_v32 = vmul.f32 0.6931472, %v1388_v24  ;;  %1415 = vlog2.f32 %v393_v15  ;;  %v2049_v43 = vmul.f32 1.442695, %v422_v21  ;;  %v546_v3 = vsub.f32 %v2045_v37, %v1987_v40 }
  0xc4   : > { %v1392_v35 = vpop.eup %1391  ;;  %v428_v36 = vmul.f32 0.6931472, %v1390_v29  ;;  %1417 = vlog2.f32 %v394_v20  ;;  %v2051_v46 = vmul.f32 1.442695, %v424_v26  ;;  %v547_v4 = vsub.f32 %v2047_v38, %v1990_v44 }
  0xc5   : > { %v1394_v41 = vpop.eup %1393  ;;  %v430_v42 = vmul.f32 0.6931472, %v1392_v35  ;;  %1419 = vlog2.f32 %v395_v25  ;;  %v2053_v51 = vmul.f32 1.442695, %v426_v32  ;;  %v548_v13 = vsub.f32 %v2049_v43, %v1992_v45 }
  0xc6   : > { %v1396_v47 = vpop.eup %1395  ;;  %v432_v48 = vmul.f32 0.6931472, %v1394_v41  ;;  %1421 = vlog2.f32 %v396_v30  ;;  %v2057_v57 = vmul.f32 1.442695, %v428_v36  ;;  %v549_v15 = vsub.f32 %v2051_v46, %v1997_v50 }
  0xc7   : > { %v1398_v53 = vpop.eup %1397  ;;  %v434_v56 = vmul.f32 0.6931472, %v1396_v47  ;;  %1423 = vlog2.f32 %v397_v31  ;;  %v2061_v2 = vmul.f32 1.442695, %v430_v42  ;;  %v550_v20 = vsub.f32 %v2053_v51, %v2002_v55 }
  0xc8   : > { %v1400_v61 = vpop.eup %1399  ;;  %v436_v62 = vmul.f32 0.6931472, %v1398_v53  ;;  %v2067_v10 = vmul.f32 1.442695, %v432_v48  ;;  %v2080_v21 = vadd.f32 5.321928, %v537_v6  ;;  %v551_v27 = vsub.f32 %v2057_v57, %v2007_v60 }
  0xc9   : > { %v1402_v7 = vpop.eup %1401  ;;  %v438_v8 = vmul.f32 0.6931472, %v1400_v61  ;;  %v2073_v19 = vmul.f32 1.442695, %v434_v56  ;;  %v2089_v29 = vadd.f32 5.321928, %v538_v12  ;;  %v552_v49 = vsub.f32 %v2061_v2, %v2014_v1 }
  0xca   : > { %v1404_v16 = vpop.eup %1403  ;;  %v440_v17 = vmul.f32 0.6931472, %v1402_v7  ;;  %v2082_v26 = vmul.f32 1.442695, %v436_v62  ;;  %v2098_v6 = vadd.f32 5.321928, %v539_v18  ;;  %v553_v54 = vsub.f32 %v2067_v10, %v1985_v39 }
  0xcb   : > { %v1406_v24 = vpop.eup %1405  ;;  %v442_v25 = vmul.f32 0.6931472, %v1404_v16  ;;  %v2091_v32 = vmul.f32 1.442695, %v438_v8  ;;  %v2107_v12 = vadd.f32 5.321928, %v540_v22  ;;  %v554_v59 = vsub.f32 %v2073_v19, %v1987_v40 }
  0xcc   : > { %v1408_v30 = vpop.eup %1407  ;;  %v444_v31 = vmul.f32 0.6931472, %v1406_v24  ;;  %v2100_v36 = vmul.f32 1.442695, %v440_v17  ;;  %v2116_v18 = vadd.f32 5.321928, %v541_v23  ;;  %v555_v63 = vsub.f32 %v2082_v26, %v1990_v44 }
  0xcd   : > { %v1410_v33 = vpop.eup %1409  ;;  %v446_v35 = vmul.f32 0.6931472, %v1408_v30  ;;  %v2109_v42 = vmul.f32 1.442695, %v442_v25  ;;  %v2125_v22 = vadd.f32 5.321928, %v542_v28  ;;  %v556_v0 = vsub.f32 %v2091_v32, %v1992_v45 }
  0xce   : > { %v1412_v37 = vpop.eup %1411  ;;  %v448_v41 = vmul.f32 0.6931472, %v1410_v33  ;;  %v2118_v51 = vmul.f32 1.442695, %v444_v31  ;;  %v2132_v23 = vadd.f32 5.321928, %v543_v34  ;;  %v557_v8 = vsub.f32 %v2100_v36, %v1997_v50 }
  0xcf   : > { %v1414_v47 = vpop.eup %1413  ;;  %v450_v48 = vmul.f32 0.6931472, %v1412_v37  ;;  %v487_v61 = vmul.f32 1.442695, %v446_v35  ;;  %v2136_v5 = vadd.f32 5.321928, %v544_v52  ;;  %v558_v19 = vsub.f32 %v2109_v42, %v2002_v55 }
  0xd0   : > { %v1416_v53 = vpop.eup %1415  ;;  %v452_v56 = vmul.f32 0.6931472, %v1414_v47  ;;  %v488_v7 = vmul.f32 1.442695, %v448_v41  ;;  %v559_v34 = vsub.f32 %v2118_v51, %v2007_v60  ;;  %v2142_v26 = vadd.f32 5.321928, %v545_v58 }
  0xd1   : > { %v1418_v62 = vpop.eup %1417  ;;  %v454_v2 = vmul.f32 0.6931472, %v1416_v53  ;;  %v489_v16 = vmul.f32 1.442695, %v450_v48  ;;  %v560_v32 = vsub.f32 %v487_v61, %v2014_v1  ;;  %v2145_v33 = vadd.f32 5.321928, %v546_v3 }
  0xd2   : > { %v1420_v28 = vpop.eup %1419  ;;  %v456_v10 = vmul.f32 0.6931472, %v1418_v62  ;;  %v490_v17 = vmul.f32 1.442695, %v452_v56  ;;  %v561_v37 = vsub.f32 %v488_v7, %v1985_v39  ;;  %v2151_v41 = vadd.f32 5.321928, %v547_v4 }
  0xd3   : > { %v1422_v24 = vpop.eup %1421  ;;  %v458_v25 = vmul.f32 0.6931472, %v1420_v28  ;;  %v491_v11 = vmul.f32 1.442695, %v454_v2  ;;  %v562_v42 = vsub.f32 %v489_v16, %v1987_v40  ;;  %v2158_v3 = vadd.f32 5.321928, %v548_v13 }
  0xd4   : > { %v1424_v30 = vpop.eup %1423  ;;  %v460_v31 = vmul.f32 0.6931472, %v1422_v24  ;;  %v492_v52 = vmul.f32 1.442695, %v456_v10  ;;  %v563_v47 = vsub.f32 %v490_v17, %v1990_v44  ;;  %v2164_v38 = vadd.f32 5.321928, %v549_v15 }
  0xd5   : > { %v462_v35 = vmul.f32 0.6931472, %v1424_v30  ;;  %v493_v36 = vmul.f32 1.442695, %v458_v25  ;;  %v564_v39 = vsub.f32 %v491_v11, %v1992_v45  ;;  %v2166_v4 = vadd.f32 5.321928, %v550_v20 }
  0xd6   : > { %v494_v58 = vmul.f32 1.442695, %v460_v31  ;;  %v2169_v40 = vld [vmem:[%s1917_s9] sm:$0xff]  ;;  %v2172_v44 = vld [vmem:[%s1917_s9 + $0x8] sm:$0xff]  ;;  %v565_v43 = vsub.f32 %v492_v52, %v1997_v50  ;;  %v2179_v45 = vadd.f32 5.321928, %v551_v27 }
  0xd7   : > { %v495_v48 = vmul.f32 1.442695, %v462_v35  ;;  %v566_v13 = vsub.f32 %v493_v36, %v2002_v55  ;;  %v2181_v46 = vadd.f32 5.321928, %v552_v49  ;;  %v2184_v15 = vld [vmem:[%s1917_s9 + $0x10] sm:$0xff]  ;;  %v2187_v20 = vld [vmem:[%s1917_s9 + $0x18] sm:$0xff]  ;;  %v601_v11 = vsub.f32 %v2169_v40, %v2080_v21 }
  0xd8   : > { %v2190_v51 = vld [vmem:[%s1917_s9 + $0x20] sm:$0xff]  ;;  %v567_v50 = vsub.f32 %v494_v58, %v2007_v60  ;;  %v2193_v55 = vadd.f32 5.321928, %v553_v54  ;;  %v2195_v53 = vadd.f32 5.321928, %v554_v59  ;;  %v2200_v27 = vld [vmem:[%s1917_s9 + $0x28] sm:$0xff]  ;;  %v602_v52 = vsub.f32 %v2172_v44, %v2089_v29 }
  0xd9   : > { %v2197_v57 = vadd.f32 5.321928, %v555_v63  ;;  %v2203_v49 = vld [vmem:[%s1917_s9 + $0x30] sm:$0xff]  ;;  %v2206_v56 = vld [vmem:[%s1917_s9 + $0x38] sm:$0xff]  ;;  %v2209_v61 = vld [vmem:[%s1917_s9 + $0x40] sm:$0xff]  ;;  %v568_v62 = vsub.f32 %v495_v48, %v2014_v1  ;;  %v603_v21 = vsub.f32 %v2184_v15, %v2098_v6  ;;  %v604_v58 = vsub.f32 %v2187_v20, %v2107_v12 }
  0xda   : > { %v2212_v60 = vadd.f32 5.321928, %v556_v0  ;;  %v2214_v54 = vadd.f32 5.321928, %v557_v8  ;;  %v2216_v59 = vadd.f32 5.321928, %v558_v19  ;;  %v607_v40 = vsub.f32 %v2203_v49, %v2132_v23 }
  0xdb   : > { %v2219_v63 = vld [vmem:[%s1917_s9 + $0x48] sm:$0xff]  ;;  %v2222_v2 = vld [vmem:[%s1917_s9 + $0x50] sm:$0xff]  ;;  %v2225_v7 = vld [vmem:[%s1917_s9 + $0x58] sm:$0xff]  ;;  %v2230_v10 = vadd.f32 5.321928, %v559_v34  ;;  %v608_v6 = vsub.f32 %v2206_v56, %v2136_v5  ;;  %v609_v12 = vsub.f32 %v2209_v61, %v2142_v26 }
  0xdc   : > { %v2228_v28 = vld [vmem:[%s1917_s9 + $0x60] sm:$0xff]  ;;  %v2232_v1 = vadd.f32 5.321928, %v560_v32  ;;  %v2234_v0 = vadd.f32 5.321928, %v561_v37  ;;  %v2237_v8 = vld [vmem:[%s1917_s9 + $0x68] sm:$0xff]  ;;  %v612_v23 = vsub.f32 %v2225_v7, %v2158_v3 }
  0xdd   : > { %v2240_v16 = vld [vmem:[%s1917_s9 + $0x70] sm:$0xff]  ;;  %v2243_v17 = vld [vmem:[%s1917_s9 + $0x78] sm:$0xff]  ;;  %v2245_v19 = vadd.f32 5.321928, %v562_v42  ;;  %v2247_v24 = vadd.f32 5.321928, %v563_v47  ;;  %v605_v42 = vsub.f32 %v2190_v51, %v2116_v18  ;;  %v613_v5 = vsub.f32 %v2228_v28, %v2164_v38 }
  0xde   : > { %v2249_v25 = vadd.f32 5.321928, %v564_v39  ;;  %v2253_v34 = vadd.f32 5.321928, %v565_v43  ;;  %v2255_v30 = vadd.f32 5.321928, %v566_v13  ;;  %v606_v39 = vsub.f32 %v2200_v27, %v2125_v22 }
  0xdf   : > { %v2257_v31 = vadd.f32 5.321928, %v567_v50  ;;  %v350_v32 = vld [vmem:[%s1917_s9 + $0x80] sm:$0xff]  ;;  %v351_v35 = vld [vmem:[%s1917_s9 + $0x88] sm:$0xff]  ;;  %v2264_v36 = vld [vmem:[%s1917_s9 + $0x90] sm:$0xff]  ;;  %v610_v13 = vsub.f32 %v2219_v63, %v2145_v33  ;;  %v611_v22 = vsub.f32 %v2222_v2, %v2151_v41  ;;  %v614_v26 = vsub.f32 %v2237_v8, %v2166_v4 }
  0xe0   : > { %v2266_v37 = vadd.f32 5.321928, %v568_v62  ;;  %v353_v47 = vld [vmem:[%s1917_s9 + $0x98] sm:$0xff]  ;;  %v354_v29 = vld [vmem:[%s1917_s9 + $0xa0] sm:$0xff]  ;;  %v355_v48 = vld [vmem:[%s1917_s9 + $0xa8] sm:$0xff]  ;;  %v615_v20 = vsub.f32 %v2240_v16, %v2179_v45  ;;  %v616_v33 = vsub.f32 %v2243_v17, %v2181_v46  ;;  %v617_v51 = vsub.f32 %v350_v32, %v2193_v55 }
  0xe1   : > { %v356_v44 = vld [vmem:[%s1917_s9 + $0xb0] sm:$0xff]  ;;  %v357_v43 = vld [vmem:[%s1917_s9 + $0xb8] sm:$0xff]  ;;  %v358_v18 = vld [vmem:[%s1917_s9 + $0xc0] sm:$0xff]  ;;  %v618_v50 = vsub.f32 %v351_v35, %v2195_v53  ;;  %v619_v3 = vsub.f32 %v2264_v36, %v2197_v57  ;;  %v620_v38 = vsub.f32 %v353_v47, %v2212_v60  ;;  %v621_v4 = vsub.f32 %v354_v29, %v2214_v54 }
  0xe2   : > { %v359_v15 = vld [vmem:[%s1917_s9 + $0xc8] sm:$0xff]  ;;  %v360_v41 = vld [vmem:[%s1917_s9 + $0xd0] sm:$0xff]  ;;  %v361_v27 = vld [vmem:[%s1917_s9 + $0xd8] sm:$0xff]  ;;  %v622_v45 = vsub.f32 %v355_v48, %v2216_v59  ;;  %v623_v46 = vsub.f32 %v356_v44, %v2230_v10  ;;  %v624_v55 = vsub.f32 %v357_v43, %v2232_v1  ;;  %v625_v61 = vsub.f32 %v358_v18, %v2234_v0 }
  0xe3   : > { %v362_v49 = vld [vmem:[%s1917_s9 + $0xe0] sm:$0xff]  ;;  %v363_v56 = vld [vmem:[%s1917_s9 + $0xe8] sm:$0xff]  ;;  %v364_v53 = vld [vmem:[%s1917_s9 + $0xf0] sm:$0xff]  ;;  %v626_v62 = vsub.f32 %v359_v15, %v2245_v19  ;;  %v2319_v63 = vand.u32 2147483647, %v601_v11  ;;  %v627_v2 = vsub.f32 %v360_v41, %v2247_v24  ;;  %v628_v10 = vsub.f32 %v361_v27, %v2249_v25 }
  0xe4   : > { %v2321_v57 = vand.u32 2147483647, %v602_v52  ;;  %v2323_v60 = vand.u32 2147483647, %v603_v21  ;;  %v365_v54 = vld [vmem:[%s1917_s9 + $0xf8] sm:$0xff]  ;;  %v629_v16 = vsub.f32 %v362_v49, %v2253_v34  ;;  %v630_v11 = vsub.f32 %v363_v56, %v2255_v30 }
  0xe5   : > { %v2327_v7 = vand.u32 2147483647, %v604_v58  ;;  %v2329_v59 = vand.u32 2147483647, %v605_v42  ;;  %v2331_v28 = vand.u32 2147483647, %v606_v39  ;;  %v631_v35 = vsub.f32 %v364_v53, %v2257_v31 }
  0xe6   : > { %v2334_v1 = vand.u32 2147483647, %v607_v40  ;;  %v2336_v0 = vand.u32 2147483647, %v608_v6  ;;  %v2338_v8 = vand.u32 2147483647, %v609_v12  ;;  %v632_v58 = vsub.f32 %v365_v54, %v2266_v37 }
  0xe7   : > { %v2341_v17 = vand.u32 2147483647, %v610_v13  ;;  %v2343_v19 = vand.u32 2147483647, %v611_v22  ;;  %v2345_v24 = vand.u32 2147483647, %v612_v23 }
  0xe8   : > { %2632 = vst [vmem:[#allocation26_spill] sm:$0xff] %v2334_v1  ;;  %2633 = vst [vmem:[#allocation27_spill] sm:$0xff] %v2336_v0  ;;  %v2348_v52 = vand.u32 2147483647, %v613_v5  ;;  %v2350_v32 = vand.u32 2147483647, %v614_v26 }
  0xe9   : > { %v2352_v25 = vand.u32 2147483647, %v615_v20  ;;  %v2355_v36 = vand.u32 2147483647, %v616_v33  ;;  %v2357_v21 = vand.u32 2147483647, %v617_v51 }
  0xea   : > { %2634 = vst [vmem:[#allocation28_spill] sm:$0xff] %v2350_v32  ;;  %v2359_v34 = vand.u32 2147483647, %v618_v50  ;;  %v2362_v42 = vand.u32 2147483647, %v619_v3 }
  0xeb   : > { %2635 = vst [vmem:[#allocation29_spill] sm:$0xff] %v2352_v25  ;;  %2636 = vst [vmem:[#allocation30_spill] sm:$0xff] %v2355_v36  ;;  %v2364_v47 = vand.u32 2147483647, %v620_v38  ;;  %v2366_v30 = vand.u32 2147483647, %v621_v4 }
  0xec   : > { %2637 = vst [vmem:[#allocation31_spill] sm:$0xff] %v2357_v21  ;;  %2638 = vst [vmem:[#allocation32_spill] sm:$0xff] %v2359_v34  ;;  %v2368_v29 = vand.u32 2147483647, %v622_v45  ;;  %v2370_v48 = vand.u32 2147483647, %v623_v46 }
  0xed   : > { %2639 = vst [vmem:[#allocation33_spill] sm:$0xff] %v2362_v42  ;;  %2640 = vst [vmem:[#allocation34_spill] sm:$0xff] %v2364_v47  ;;  %v2372_v39 = vand.u32 2147483647, %v624_v55  ;;  %v2374_v31 = vand.u32 2147483647, %v625_v61 }
  0xee   : > { %2641 = vst [vmem:[#allocation35_spill] sm:$0xff] %v2366_v30  ;;  %2642 = vst [vmem:[#allocation36_spill] sm:$0xff] %v2368_v29  ;;  %v2376_v40 = vand.u32 2147483647, %v626_v62  ;;  %v2378_v6 = vand.u32 2147483647, %v627_v2 }
  0xef   : > { %2643 = vst [vmem:[#allocation37_spill] sm:$0xff] %v2370_v48  ;;  %2644 = vst [vmem:[#allocation38_spill] sm:$0xff] %v2372_v39  ;;  %v2380_v12 = vand.u32 2147483647, %v628_v10  ;;  %v2382_v37 = vand.u32 2147483647, %v629_v16 }
  0xf0   : > { %2645 = vst [vmem:[#allocation39_spill] sm:$0xff] %v2374_v31  ;;  %2646 = vst [vmem:[#allocation40_spill] sm:$0xff] %v2376_v40  ;;  %v2384_v44 = vand.u32 2147483647, %v630_v11  ;;  %v2386_v43 = vand.u32 2147483647, %v631_v35 }
  0xf1   : > { %2647 = vst [vmem:[#allocation41_spill] sm:$0xff] %v2378_v6  ;;  %2648 = vst [vmem:[#allocation42_spill] sm:$0xff] %v2380_v12  ;;  %v2388_v18 = vand.u32 2147483647, %v632_v58  ;;  %668 = sbr.rel (%p1216_p13) target bundleno = 297 (0x129), region = 52 }
  0xf2   : > { %2649 = vst [vmem:[#allocation43_spill] sm:$0xff] %v2382_v37  ;;  %2650 = vst [vmem:[#allocation44_spill] sm:$0xff] %v2384_v44 }
  0xf3   : > { %2651 = vst [vmem:[#allocation45_spill] sm:$0xff] %v2386_v43  ;;  %2652 = vst [vmem:[#allocation46_spill] sm:$0xff] %v2388_v18 }
  0xf6   : > { %v671_v13 = vand.u32 127, %v497_v9  ;;  %v679_v22 = vstv %s1217_s12 }
  0xf8   : > { %v672_v23 = vadd.s32 128, %v671_v13  ;;  %v673_v5 = vadd.s32 256, %v671_v13  ;;  %v674_v15 = vadd.s32 384, %v671_v13  ;;  %v675_v26 = vadd.s32 512, %v671_v13 }
  0xf9   : > { %v676_v20 = vadd.s32 640, %v671_v13  ;;  %v677_v33 = vadd.s32 768, %v671_v13  ;;  %v678_v51 = vadd.s32 896, %v671_v13  ;;  %v680_v41 = vadd.s32 %v679_v22, %v671_v13 }
  0xfa   : > { %v681_v50 = vadd.s32 %v679_v22, %v672_v23  ;;  %v682_v3 = vadd.s32 %v679_v22, %v673_v5  ;;  %v683_v38 = vadd.s32 %v679_v22, %v674_v15  ;;  %v684_v4 = vadd.s32 %v679_v22, %v675_v26 }
  0xfb   : > { %v685_v27 = vadd.s32 %v679_v22, %v676_v20  ;;  %v686_v49 = vadd.s32 %v679_v22, %v677_v33  ;;  %v687_v56 = vadd.s32 %v679_v22, %v678_v51  ;;  %vm688_vm0 = vcmp.lt.s32.totalorder %v680_v41, 1300 }
  0xfc   : > { %vm689_vm1 = vcmp.lt.s32.totalorder %v681_v50, 1300  ;;  %vm690_vm2 = vcmp.lt.s32.totalorder %v682_v3, 1300  ;;  %vm691_vm3 = vcmp.lt.s32.totalorder %v683_v38, 1300  ;;  %vm692_vm4 = vcmp.lt.s32.totalorder %v684_v4, 1300 }
  0xfd   : > { %vm693_vm5 = vcmp.lt.s32.totalorder %v685_v27, 1300  ;;  %vm694_vm6 = vcmp.lt.s32.totalorder %v686_v49, 1300  ;;  %vm695_vm7 = vcmp.lt.s32.totalorder %v687_v56, 1300  ;;  %v696_v9 = vsel %vm688_vm0, %v2319_v63, 0.0 }
  0xfe   : > { %v697_v45 = vsel %vm689_vm1, %v2321_v57, 0.0  ;;  %v698_v46 = vsel %vm690_vm2, %v2323_v60, 0.0  ;;  %v699_v55 = vsel %vm691_vm3, %v2327_v7, 0.0  ;;  %v700_v61 = vsel %vm692_vm4, %v2329_v59, 0.0 }
  0xff   : > { %v701_v53 = vsel %vm693_vm5, %v2331_v28, 0.0  ;;  %v702_v62 = vsel %vm694_vm6, %v2334_v1, 0.0  ;;  %v703_v54 = vsel %vm695_vm7, %v2336_v0, 0.0  ;;  %v704_v2 = vsel %vm688_vm0, %v2338_v8, 0.0 }
 0x100   : > { %v705_v10 = vsel %vm689_vm1, %v2341_v17, 0.0  ;;  %v706_v16 = vsel %vm690_vm2, %v2343_v19, 0.0  ;;  %v707_v11 = vsel %vm691_vm3, %v2345_v24, 0.0  ;;  %v708_v35 = vsel %vm692_vm4, %v2348_v52, 0.0 }
 0x101   : > { %v709_v58 = vsel %vm693_vm5, %v2350_v32, 0.0  ;;  %v710_v13 = vsel %vm694_vm6, %v2352_v25, 0.0  ;;  %v711_v22 = vsel %vm695_vm7, %v2355_v36, 0.0  ;;  %v712_v23 = vsel %vm688_vm0, %v2357_v21, 0.0 }
 0x102   : > { %v713_v5 = vsel %vm689_vm1, %v2359_v34, 0.0  ;;  %v714_v15 = vsel %vm690_vm2, %v2362_v42, 0.0  ;;  %v715_v26 = vsel %vm691_vm3, %v2364_v47, 0.0  ;;  %v716_v20 = vsel %vm692_vm4, %v2366_v30, 0.0 }
 0x103   : > { %v717_v33 = vsel %vm693_vm5, %v2368_v29, 0.0  ;;  %v718_v51 = vsel %vm694_vm6, %v2370_v48, 0.0  ;;  %v719_v21 = vsel %vm695_vm7, %v2372_v39, 0.0  ;;  %v720_v34 = vsel %vm688_vm0, %v2374_v31, 0.0 }
 0x104   : > { %v721_v42 = vsel %vm689_vm1, %v2376_v40, 0.0  ;;  %v722_v47 = vsel %vm690_vm2, %v2378_v6, 0.0  ;;  %v723_v30 = vsel %vm691_vm3, %v2380_v12, 0.0  ;;  %v724_v29 = vsel %vm692_vm4, %v2382_v37, 0.0 }
 0x105   : > { %v725_v48 = vsel %vm693_vm5, %v2384_v44, 0.0  ;;  %v726_v39 = vsel %vm694_vm6, %v2386_v43, 0.0  ;;  %v727_v41 = vsel %vm695_vm7, %v2388_v18, 0.0  ;;  %v728_v50 = vadd.f32 %v704_v2, %v696_v9 }
 0x106   : > { %v737_v40 = vadd.f32 %v705_v10, %v697_v45  ;;  %v746_v31 = vadd.f32 %v706_v16, %v698_v46  ;;  %v755_v3 = vadd.f32 %v707_v11, %v699_v55  ;;  %v764_v6 = vadd.f32 %v708_v35, %v700_v61 }
 0x107   : > { %v729_v36 = vadd.f32 %v728_v50, %v712_v23  ;;  %v773_v38 = vadd.f32 %v709_v58, %v701_v53  ;;  %v782_v12 = vadd.f32 %v710_v13, %v702_v62  ;;  %v791_v0 = vadd.f32 %v711_v22, %v703_v54 }
 0x108   : > { %v738_v4 = vadd.f32 %v737_v40, %v713_v5  ;;  %v747_v37 = vadd.f32 %v746_v31, %v714_v15  ;;  %v756_v25 = vadd.f32 %v755_v3, %v715_v26  ;;  %v765_v27 = vadd.f32 %v764_v6, %v716_v20 }
 0x109   : > { %v730_v44 = vadd.f32 %v729_v36, %v720_v34  ;;  %v774_v1 = vadd.f32 %v773_v38, %v717_v33  ;;  %v783_v49 = vadd.f32 %v782_v12, %v718_v51  ;;  %v792_v43 = vadd.f32 %v791_v0, %v719_v21 }
 0x10a   : > { %v739_v32 = vadd.f32 %v738_v4, %v721_v42  ;;  %v748_v56 = vadd.f32 %v747_v37, %v722_v47  ;;  %v757_v18 = vadd.f32 %v756_v25, %v723_v30  ;;  %v766_v9 = vadd.f32 %v765_v27, %v724_v29 }
 0x10b   : > { %v731_v45 = vrot.slane %v730_v44, 4  ;;  %v775_v46 = vadd.f32 %v774_v1, %v725_v48  ;;  %v784_v55 = vadd.f32 %v783_v49, %v726_v39  ;;  %v793_v61 = vadd.f32 %v792_v43, %v727_v41 }
 0x10c   : > { %v740_v2 = vrot.slane %v739_v32, 4  ;;  %v749_v53 = vrot.slane %v748_v56, 4  ;;  %v758_v62 = vrot.slane %v757_v18, 4  ;;  %v767_v54 = vrot.slane %v766_v9, 4 }
 0x10d   : > { %v732_v40 = vadd.f32 %v731_v45, %v730_v44  ;;  %v776_v31 = vrot.slane %v775_v46, 4  ;;  %v785_v10 = vrot.slane %v784_v55, 4  ;;  %v794_v6 = vrot.slane %v793_v61, 4 }
 0x10e   : > { %v741_v36 = vadd.f32 %v740_v2, %v739_v32  ;;  %v750_v34 = vadd.f32 %v749_v53, %v748_v56  ;;  %v759_v12 = vadd.f32 %v758_v62, %v757_v18  ;;  %v768_v0 = vadd.f32 %v767_v54, %v766_v9 }
 0x10f   : > { %v733_v21 = vrot.slane %v732_v40, 2  ;;  %v777_v42 = vadd.f32 %v776_v31, %v775_v46  ;;  %v786_v25 = vadd.f32 %v785_v10, %v784_v55  ;;  %v795_v47 = vadd.f32 %v794_v6, %v793_v61  ;;  %v800_v6 = vld [vmem:[%s1941_s13] ss:$8 sm:$0xf] }
 0x110   : > { %v742_v30 = vrot.slane %v741_v36, 2  ;;  %v751_v1 = vrot.slane %v750_v34, 2  ;;  %v760_v29 = vrot.slane %v759_v12, 2  ;;  %v769_v48 = vrot.slane %v768_v0, 2 }
 0x111   : > { %v734_v39 = vadd.f32 %v733_v21, %v732_v40  ;;  %v778_v37 = vrot.slane %v777_v42, 2  ;;  %v787_v43 = vrot.slane %v786_v25, 2  ;;  %v796_v16 = vrot.slane %v795_v47, 2 }
 0x112   : > { %v743_v44 = vadd.f32 %v742_v30, %v741_v36  ;;  %v752_v11 = vadd.f32 %v751_v1, %v750_v34  ;;  %v761_v35 = vadd.f32 %v760_v29, %v759_v12  ;;  %v770_v58 = vadd.f32 %v769_v48, %v768_v0  ;;  %v801_v36 = vld [vmem:[%s1941_s13] ss:$8 sm:$0xf0] }
 0x113   : > { %v735_v32 = vrot.slane %v734_v39, 1  ;;  %v779_v13 = vadd.f32 %v778_v37, %v777_v42  ;;  %v788_v18 = vadd.f32 %v787_v43, %v786_v25  ;;  %v797_v22 = vadd.f32 %v796_v16, %v795_v47 }
 0x114   : > { %v744_v23 = vrot.slane %v743_v44, 1  ;;  %v753_v5 = vrot.slane %v752_v11, 1  ;;  %v762_v15 = vrot.slane %v761_v35, 1  ;;  %v771_v26 = vrot.slane %v770_v58, 1 }
 0x115   : > { %v736_v20 = vadd.f32 %v735_v32, %v734_v39  ;;  %v780_v33 = vrot.slane %v779_v13, 1  ;;  %v789_v51 = vrot.slane %v788_v18, 1  ;;  %v798_v41 = vrot.slane %v797_v22, 1 }
 0x116   : > { %v745_v50 = vadd.f32 %v744_v23, %v743_v44  ;;  %v754_v3 = vadd.f32 %v753_v5, %v752_v11  ;;  %v763_v38 = vadd.f32 %v762_v15, %v761_v35  ;;  %v772_v4 = vadd.f32 %v771_v26, %v770_v58 }
 0x117   : > { %v781_v27 = vadd.f32 %v780_v33, %v779_v13  ;;  %v790_v49 = vadd.f32 %v789_v51, %v788_v18  ;;  %v799_v56 = vadd.f32 %v798_v41, %v797_v22  ;;  %v1665_v9 = vmov 1966171168  }
 0x118   : > { %v816_v45 = vunpack.c.l.s4 %v1665_v9  ;;  %v811_v46 = vcombine.low %v736_v20, %v745_v50  ;;  %v812_v55 = vcombine.low %v754_v3, %v763_v38  ;;  %v802_v0 = vor.u32 %v801_v36, %v800_v6 }
 0x119   : > { %v813_v61 = vcombine.low %v772_v4, %v781_v27  ;;  %v814_v2 = vcombine.low %v790_v49, %v799_v56 }
 0x11a   : > { %v817_v53 = vunpack.c.0.s8 %v816_v45 }
 0x11c   : > { %v820_v62 = vsub.s32 %v817_v53, %v1965_v14 }
 0x11e   : > { %v821_v54 = vrot.slane %v811_v46, %v820_v62  ;;  %v828_v40 = vrot.slane %v812_v55, %v820_v62  ;;  %v835_v31 = vrot.slane %v813_v61, %v820_v62  ;;  %v842_v10 = vrot.slane %v814_v2, %v820_v62 }
 0x120   : > { %v843_v34 = vcombine.low %v821_v54, %v828_v40  ;;  %v844_v12 = vcombine.low %v835_v31, %v842_v10 }
 0x122   : > { %v851_v21 = vrot.slane %v843_v34, %v820_v62  ;;  %v858_v42 = vrot.slane %v844_v12, %v820_v62 }
 0x124   : > { %v859_v25 = vcombine.low %v851_v21, %v858_v42 }
 0x126   : > { %v861_v47 = vadd.f32 %v859_v25, %v802_v0 }
 0x128   : > { %862 = vst [vmem:[%s1941_s13] ss:$8 sm:$0xf] %v861_v47  ;;  %863 = vst [vmem:[%s1941_s13] ss:$8 sm:$0xf0] %v861_v47 }
 0x129 PF: > { %s2655_s5 = sld [smem:[#allocation16_spill]] }
 0x12f   : > { %p1218_p7 = scmp.eq.s32.totalorder %s2655_s5, 1 }
 0x131   : > { %867 = sbr.rel (%p1218_p7) target bundleno = 347 (0x15b), region = 56 }
 0x136   : > { %v868_v30 = vadd.f32 %v2338_v8, %v2319_v63  ;;  %v877_v1 = vadd.f32 %v2341_v17, %v2321_v57  ;;  %v886_v29 = vadd.f32 %v2343_v19, %v2323_v60  ;;  %v895_v48 = vadd.f32 %v2345_v24, %v2327_v7  ;;  %v2656_v37 = vld [vmem:[#allocation28_spill] sm:$0xff]  ;;  %v2657_v16 = vld [vmem:[#allocation26_spill] sm:$0xff]  ;;  %v2658_v44 = vld [vmem:[#allocation29_spill] sm:$0xff] }
 0x137   : > { %v904_v39 = vadd.f32 %v2348_v52, %v2329_v59  ;;  %v913_v43 = vadd.f32 %v2656_v37, %v2331_v28  ;;  %v922_v11 = vadd.f32 %v2658_v44, %v2657_v16  ;;  %v2659_v35 = vld [vmem:[#allocation27_spill] sm:$0xff]  ;;  %v2660_v63 = vld [vmem:[#allocation30_spill] sm:$0xff]  ;;  %v2662_v17 = vld [vmem:[#allocation32_spill] sm:$0xff] }
 0x138   : > { %v931_v8 = vadd.f32 %v2660_v63, %v2659_v35  ;;  %v2661_v58 = vld [vmem:[#allocation31_spill] sm:$0xff]  ;;  %v878_v32 = vadd.f32 %v877_v1, %v2662_v17  ;;  %v2663_v60 = vld [vmem:[#allocation33_spill] sm:$0xff]  ;;  %v2664_v13 = vld [vmem:[#allocation34_spill] sm:$0xff] }
 0x139   : > { %v869_v57 = vadd.f32 %v868_v30, %v2661_v58  ;;  %v887_v19 = vadd.f32 %v886_v29, %v2663_v60  ;;  %v896_v7 = vadd.f32 %v895_v48, %v2664_v13  ;;  %v2665_v24 = vld [vmem:[#allocation35_spill] sm:$0xff]  ;;  %v2666_v59 = vld [vmem:[#allocation36_spill] sm:$0xff]  ;;  %v2667_v22 = vld [vmem:[#allocation37_spill] sm:$0xff] }
 0x13a   : > { %v905_v18 = vadd.f32 %v904_v39, %v2665_v24  ;;  %v914_v52 = vadd.f32 %v913_v43, %v2666_v59  ;;  %v923_v28 = vadd.f32 %v922_v11, %v2667_v22  ;;  %v2668_v23 = vld [vmem:[#allocation38_spill] sm:$0xff]  ;;  %v2669_v15 = vld [vmem:[#allocation39_spill] sm:$0xff]  ;;  %v2670_v20 = vld [vmem:[#allocation40_spill] sm:$0xff] }
 0x13b   : > { %v932_v5 = vadd.f32 %v931_v8, %v2668_v23  ;;  %v870_v26 = vadd.f32 %v869_v57, %v2669_v15  ;;  %v879_v33 = vadd.f32 %v878_v32, %v2670_v20  ;;  %v2671_v51 = vld [vmem:[#allocation41_spill] sm:$0xff]  ;;  %v2672_v50 = vld [vmem:[#allocation42_spill] sm:$0xff]  ;;  %v2673_v38 = vld [vmem:[#allocation43_spill] sm:$0xff] }
 0x13c   : > { %v888_v41 = vadd.f32 %v887_v19, %v2671_v51  ;;  %v897_v3 = vadd.f32 %v896_v7, %v2672_v50  ;;  %v906_v4 = vadd.f32 %v905_v18, %v2673_v38  ;;  %v2674_v27 = vld [vmem:[#allocation44_spill] sm:$0xff]  ;;  %v2675_v56 = vld [vmem:[#allocation45_spill] sm:$0xff]  ;;  %v2676_v45 = vld [vmem:[#allocation46_spill] sm:$0xff] }
 0x13d   : > { %v915_v49 = vadd.f32 %v914_v52, %v2674_v27  ;;  %v924_v9 = vadd.f32 %v923_v28, %v2675_v56  ;;  %v933_v46 = vadd.f32 %v932_v5, %v2676_v45  ;;  %v871_v55 = vrot.slane %v870_v26, 4  ;;  %v941_v45 = vld [vmem:[%s1941_s13] ss:$8 sm:$0xf0] }
 0x13e   : > { %v880_v61 = vrot.slane %v879_v33, 4  ;;  %v889_v2 = vrot.slane %v888_v41, 4  ;;  %v898_v53 = vrot.slane %v897_v3, 4  ;;  %v907_v62 = vrot.slane %v906_v4, 4 }
 0x13f   : > { %v916_v54 = vrot.slane %v915_v49, 4  ;;  %v925_v40 = vrot.slane %v924_v9, 4  ;;  %v934_v31 = vrot.slane %v933_v46, 4  ;;  %v872_v10 = vadd.f32 %v871_v55, %v870_v26 }
 0x140   : > { %v881_v6 = vadd.f32 %v880_v61, %v879_v33  ;;  %v890_v36 = vadd.f32 %v889_v2, %v888_v41  ;;  %v899_v34 = vadd.f32 %v898_v53, %v897_v3  ;;  %v908_v12 = vadd.f32 %v907_v62, %v906_v4 }
 0x141   : > { %v917_v0 = vadd.f32 %v916_v54, %v915_v49  ;;  %v926_v21 = vadd.f32 %v925_v40, %v924_v9  ;;  %v935_v42 = vadd.f32 %v934_v31, %v933_v46  ;;  %v873_v25 = vrot.slane %v872_v10, 2  ;;  %v940_v9 = vld [vmem:[%s1941_s13] ss:$8 sm:$0xf] }
 0x142   : > { %v882_v47 = vrot.slane %v881_v6, 2  ;;  %v891_v30 = vrot.slane %v890_v36, 2  ;;  %v900_v1 = vrot.slane %v899_v34, 2  ;;  %v909_v29 = vrot.slane %v908_v12, 2 }
 0x143   : > { %v918_v48 = vrot.slane %v917_v0, 2  ;;  %v927_v39 = vrot.slane %v926_v21, 2  ;;  %v936_v37 = vrot.slane %v935_v42, 2  ;;  %v874_v43 = vadd.f32 %v873_v25, %v872_v10 }
 0x144   : > { %v883_v16 = vadd.f32 %v882_v47, %v881_v6  ;;  %v892_v44 = vadd.f32 %v891_v30, %v890_v36  ;;  %v901_v11 = vadd.f32 %v900_v1, %v899_v34  ;;  %v910_v35 = vadd.f32 %v909_v29, %v908_v12 }
 0x145   : > { %v919_v63 = vadd.f32 %v918_v48, %v917_v0  ;;  %v928_v8 = vadd.f32 %v927_v39, %v926_v21  ;;  %v937_v58 = vadd.f32 %v936_v37, %v935_v42  ;;  %v875_v57 = vrot.slane %v874_v43, 1 }
 0x146   : > { %v884_v17 = vrot.slane %v883_v16, 1  ;;  %v893_v32 = vrot.slane %v892_v44, 1  ;;  %v902_v60 = vrot.slane %v901_v11, 1  ;;  %v911_v19 = vrot.slane %v910_v35, 1 }
 0x147   : > { %v920_v13 = vrot.slane %v919_v63, 1  ;;  %v929_v7 = vrot.slane %v928_v8, 1  ;;  %v938_v24 = vrot.slane %v937_v58, 1  ;;  %v876_v18 = vadd.f32 %v875_v57, %v874_v43 }
 0x148   : > { %v885_v59 = vadd.f32 %v884_v17, %v883_v16  ;;  %v894_v52 = vadd.f32 %v893_v32, %v892_v44  ;;  %v903_v22 = vadd.f32 %v902_v60, %v901_v11  ;;  %v912_v28 = vadd.f32 %v911_v19, %v910_v35 }
 0x149   : > { %v921_v23 = vadd.f32 %v920_v13, %v919_v63  ;;  %v930_v5 = vadd.f32 %v929_v7, %v928_v8  ;;  %v939_v15 = vadd.f32 %v938_v24, %v937_v58  ;;  %v1666_v26 = vmov 1966171168  }
 0x14a   : > { %v956_v20 = vunpack.c.l.s4 %v1666_v26  ;;  %v951_v33 = vcombine.low %v876_v18, %v885_v59  ;;  %v952_v51 = vcombine.low %v894_v52, %v903_v22  ;;  %v942_v61 = vor.u32 %v941_v45, %v940_v9 }
 0x14b   : > { %v953_v41 = vcombine.low %v912_v28, %v921_v23  ;;  %v954_v50 = vcombine.low %v930_v5, %v939_v15 }
 0x14c   : > { %v957_v3 = vunpack.c.0.s8 %v956_v20 }
 0x14e   : > { %v960_v38 = vsub.s32 %v957_v3, %v1965_v14 }
 0x150   : > { %v961_v4 = vrot.slane %v951_v33, %v960_v38  ;;  %v968_v27 = vrot.slane %v952_v51, %v960_v38  ;;  %v975_v49 = vrot.slane %v953_v41, %v960_v38  ;;  %v982_v56 = vrot.slane %v954_v50, %v960_v38 }
 0x152   : > { %v983_v46 = vcombine.low %v961_v4, %v968_v27  ;;  %v984_v55 = vcombine.low %v975_v49, %v982_v56 }
 0x154   : > { %v991_v2 = vrot.slane %v983_v46, %v960_v38  ;;  %v998_v53 = vrot.slane %v984_v55, %v960_v38 }
 0x156   : > { %v999_v62 = vcombine.low %v991_v2, %v998_v53 }
 0x158   : > { %v1001_v54 = vadd.f32 %v999_v62, %v942_v61 }
 0x15a   : > { %1002 = vst [vmem:[%s1941_s13] ss:$8 sm:$0xf] %v1001_v54  ;;  %1003 = vst [vmem:[%s1941_s13] ss:$8 sm:$0xf0] %v1001_v54 }
 0x15b PF: > { %s2677_s11 = sld [smem:[#allocation17_spill]]  ;;  %s1019_s28 = sshll.u32 %s1941_s13, 4  ;;  %s1020_s28 = int_to_ptr.vmem [resolvable:$true] %s1019_s28 }
 0x15c   : > { %s2680_s3 = sld [smem:[#allocation47_spill]]  ;;  %s1005_s30 = scalar_lea.sflag [#allocation4], %s302_s21 }
 0x15d   : > { %s1503_s7 = scalar_lea.vmem %s1020_s28, 1024  ;;  %s1667_s14 = smov [#allocation8]  }
 0x15e   : > { %p1504_p12 = scmp.ne.s32.totalorder %s1020_s28, %s1503_s7  ;;  %s1507_s26 = sshll.u32 %s1667_s14, 4  ;;  %s1508_s26 = int_to_ptr.vmem [resolvable:$false] %s1507_s26 }
 0x15f   : > { %s1509_s22 = scalar_lea.vmem %s1508_s26, 2048  ;;  %p1510_p10 = scmp.lt.s32.totalorder %s1020_s28, %s1508_s26 }
 0x160   : > { %p1505_p2 = pnand %p1504_p12, %p1823_p9  ;;  %p1511_p0 = scmp.lt.s32.totalorder %s1509_s22, %s1503_s7 }
 0x161   : > { %s1229_s8 = sshll.u32 %s2677_s11, 10 }
 0x162   : > { %s1017_s10 = scalar_lea.hbm %s2680_s3, %s1229_s8  ;;  %p1506_p6 = pneg %p1505_p2 }
 0x163   : > { %p1512_p3 = por %p1511_p0, %p1510_p10 }
 0x165   : > { %p1513_p11 = pnand %p1512_p3, %p1506_p6 }
 0x167   : > { %1516 = shalt.err (!%p1513_p11)
}
 0x168   : > { %s1517_s6 = scalar_lea.hbm %s1017_s10, 1024  ;;  %s1521_s27 = scalar_lea.hbm %s2680_s3, 2048 }
 0x169   : > { %p1518_p1 = scmp.ne.s32.totalorder %s1017_s10, %s1517_s6  ;;  %p1522_p8 = scmp.lt.s32.totalorder %s1017_s10, %s2680_s3 }
 0x16a   : > { %p1523_p13 = scmp.lt.s32.totalorder %s1521_s27, %s1517_s6 }
 0x16b   : > { %p1519_p4 = pnand %p1518_p1, %p1823_p9 }
 0x16c   : > { %p1524_p7 = por %p1523_p13, %p1522_p8 }
 0x16d   : > { %p1520_p5 = pneg %p1519_p4 }
 0x16f   : > { %p1525_p12 = pnand %p1524_p7, %p1520_p5 }
 0x171   : > { %1528 = shalt.err (!%p1525_p12)
}
 0x172   : > { %1235 = dma.vmem_to_hbm [thread:$0]  (%p1823_p9), %s1020_s28, 1024, %s1017_s10, %s1005_s30  }
 0x173 PF: > { %s2681_s5 = sld [smem:[#allocation13_spill]]  ;;  %p1241_p2 = scmp.ge.s32.totalorder %s1655_s25, 2 }
 0x174   : > { %s2682_s11 = sld [smem:[#allocation25_spill]] }
 0x179   : > { %s1031_s15 = sand.u32 1, %s2681_s5  }
 0x17a   : > { %p2683_p6 = scmp.ne.s32.totalorder %s2682_s11, 0  ;;  %s1032_s8 = scalar_lea.sflag [#allocation4], %s1031_s15 }
 0x17c   : > { %p1238_p10 = pnand %p1241_p2, %p2683_p6 }
 0x17e   : > { %p1239_p0 = pneg %p1238_p10 }
 0x180   : > { %1598 = dma.done.wait (%p1239_p0), %s1032_s8, 1024  }
 0x181   : > { %1600 = vsyncadd (%p1239_p0), %s1032_s8, 4294966272  ;;  %s22_s25 = sadd.s32 1, %s1655_s25   ;;  %s2685_s12 = sld [smem:[#allocation14_spill]] }
 0x182   : > { %p2524_p3 = scmp.ge.s32.totalorder %s22_s25, 6   ;;  %s2686_s13 = sld [smem:[#allocation15_spill]] }
 0x183   : > { %s2687_s14 = sld [smem:[#allocation23_spill]]  ;;  %s2692_s15 = smov %s1619_s16 }
 0x184   : > { %s2688_s29 = sld [smem:[#allocation20_spill]]  ;;  %s2693_s16 = smov %s1623_s17 }
 0x185   : > { %s2689_s10 = sld [smem:[#allocation21_spill]]  ;;  %s2695_s18 = smov %s1631_s19 }
 0x186   : > { %s2690_s28 = sld [smem:[#allocation18_spill]]  ;;  %s2696_s19 = smov %s1635_s20 }
 0x187   : > { %s2691_s30 = sld [smem:[#allocation19_spill]]  ;;  %s2698_s21 = smov %s1647_s23 }
 0x188   : > { %s2699_s22 = smov %s1651_s24 }
 0x189   :  { %21 = sbr.rel (!%p2524_p3) target bundleno = 14 (0xe), region = 113 }
 0x18a   : > { %s2694_s17 = smov %s2688_s29 }
 0x18b   : > { %s2697_s20 = smov %s2689_s10 }
 0x18c   : > { %s2700_s23 = smov %s2690_s28 }
 0x18d   : > { %s2701_s24 = smov %s2691_s30 }
 0x18e   :  { %1037 = vsyncpa [#allocation3], 1 }
 0x18f   :  { %1039 = vsyncpa [#allocation3 + $0x1], 1 }
 0x190   :  { %1040 = vsyncpa [#allocation6], 1 }
 0x191   :  { %1042 = vsyncpa [#allocation6 + $0x1], 1 }
 0x192   :  { %1043 = vsyncpa [#allocation4], 1 }
 0x193   :  { %1045 = vsyncpa [#allocation4 + $0x1], 1 }

</bundles_post_ra>
